<compile_context>
chip_gen: v7x
topology: tpu7x:2x2x1
jax: 0.10.0
libtpu: 0.0.40
codegen_flags: <defaults>
</compile_context>

<pallas_src>
import functools

import jax
import jax.numpy as jnp
from jax.experimental import pallas as pl
from jax.experimental.pallas import tpu as pltpu

VOCAB = 1000
EMBED = 300
HIDDEN = 128
NUM_CLASSES = 6

LANE = 128
SUBLANE = 8


def _round_up(x, m):
    return (x + m - 1) // m * m


def _sigmoid(x):
    # sigmoid(x) = 0.5 * (1 + tanh(x / 2)); keeps EUP traffic to one
    # transcendental kind (helpful on v5e's single non-bf16 EUP port).
    return 0.5 * (jnp.tanh(0.5 * x) + 1.0)


def lstm_kernel(x_ref, wih_ref, whh_ref, b_ref, wdec_ref, bdec_ref,
                out_ref, xp_sc, h_sc, c_sc, *, seq_len, batch_pad):
    """Single grid step == whole forward pass.

    x_ref   : (T*Bp, Ep)  bf16  embedded tokens (batch/embed padded, flattened)
    wih_ref : (Ep, 4H)    bf16  input->gates weight (pre-transposed, row-padded)
    whh_ref : (H, 4H)     bf16  hidden->gates weight (pre-transposed)
    b_ref   : (1, 4H)     f32   b_ih + b_hh
    wdec_ref: (H, Cp)     bf16  decoder weight (pre-transposed, lane-padded)
    bdec_ref: (1, Cp)     f32   decoder bias (lane-padded)
    out_ref : (Bp, Cp)    f32   logits (padded; sliced in the wrapper)
    xp_sc   : (T*Bp, 4H)  f32   hoisted input projection
    h_sc/c_sc:(Bp, H)     f32   recurrent state
    """
    H = HIDDEN

    # ---- Phase 1: hoisted input projection, ONE big MXU matmul. ----
    xp_sc[...] = (
        jnp.dot(x_ref[...], wih_ref[...], preferred_element_type=jnp.float32)
        + b_ref[...])

    h_sc[...] = jnp.zeros_like(h_sc)
    c_sc[...] = jnp.zeros_like(c_sc)

    # ---- Phase 2: sequential recurrence; only the K=128 matmul per step. ----
    def step(t, carry):
        row = pl.multiple_of(t * batch_pad, SUBLANE)
        gx = xp_sc[pl.ds(row, batch_pad), :]                        # (Bp, 4H)
        gh = jnp.dot(h_sc[...].astype(jnp.bfloat16), whh_ref[...],
                     preferred_element_type=jnp.float32)            # (Bp, 4H)
        gates = gx + gh
        # PyTorch gate order: i, f, g, o (static, lane-aligned slices).
        i = _sigmoid(gates[:, 0 * H:1 * H])
        f = _sigmoid(gates[:, 1 * H:2 * H])
        g = jnp.tanh(gates[:, 2 * H:3 * H])
        o = _sigmoid(gates[:, 3 * H:4 * H])
        c = f * c_sc[...] + i * g
        h_sc[...] = o * jnp.tanh(c)
        c_sc[...] = c
        return carry

    jax.lax.fori_loop(0, seq_len, step, 0, unroll=True)

    # ---- Phase 3: decoder on the last hidden state (lane-dense store). ----
    out_ref[...] = (
        jnp.dot(h_sc[...].astype(jnp.bfloat16), wdec_ref[...],
                preferred_element_type=jnp.float32)
        + bdec_ref[...])


def lstm_forward(sentence, params):
    """sentence: (T, B) int32 token ids -> (B, NUM_CLASSES) float32 logits."""
    emb_table, w_ih, w_hh, b_ih, b_hh, w_dec, b_dec = params
    T, B = sentence.shape

    Bp = _round_up(max(B, SUBLANE), SUBLANE)   # batch -> full sublanes
    Ep = _round_up(EMBED, LANE)                # 300 -> 384 (lane multiple)
    Cp = LANE                                  # 6 -> 128 (lane-dense output)
    G = 4 * HIDDEN

    # TODO(synk): embedding gather kept in plain JAX; token-id row gather has
    # no clean rectangular BlockSpec form at this single-invocation layout.
    x = jnp.take(emb_table, sentence, axis=0)                 # (T, B, E) f32
    x = jnp.pad(x, ((0, 0), (0, Bp - B), (0, Ep - EMBED)))
    x_flat = x.reshape(T * Bp, Ep).astype(jnp.bfloat16)

    wih_t = jnp.pad(w_ih.T, ((0, Ep - EMBED), (0, 0))).astype(jnp.bfloat16)
    whh_t = w_hh.T.astype(jnp.bfloat16)
    b = (b_ih + b_hh).astype(jnp.float32)[None, :]
    wdec_t = jnp.pad(w_dec.T, ((0, 0), (0, Cp - NUM_CLASSES))).astype(jnp.bfloat16)
    bdec = jnp.pad(b_dec, (0, Cp - NUM_CLASSES)).astype(jnp.float32)[None, :]

    kernel = functools.partial(lstm_kernel, seq_len=T, batch_pad=Bp)

    grid_spec = pltpu.PrefetchScalarGridSpec(
        num_scalar_prefetch=0,
        grid=(1,),  # single invocation; timestep loop lives inside the kernel
        in_specs=[
            pl.BlockSpec((T * Bp, Ep), lambda i: (0, 0)),
            pl.BlockSpec((Ep, G), lambda i: (0, 0)),
            pl.BlockSpec((HIDDEN, G), lambda i: (0, 0)),
            pl.BlockSpec((1, G), lambda i: (0, 0)),
            pl.BlockSpec((HIDDEN, Cp), lambda i: (0, 0)),
            pl.BlockSpec((1, Cp), lambda i: (0, 0)),
        ],
        out_specs=pl.BlockSpec((Bp, Cp), lambda i: (0, 0)),
        scratch_shapes=[
            pltpu.VMEM((T * Bp, G), jnp.float32),   # hoisted input projection
            pltpu.VMEM((Bp, HIDDEN), jnp.float32),  # h
            pltpu.VMEM((Bp, HIDDEN), jnp.float32),  # c
        ],
    )

    out_padded = pl.pallas_call(
        kernel,
        out_shape=jax.ShapeDtypeStruct((Bp, Cp), jnp.float32),
        grid_spec=grid_spec,
        compiler_params=pltpu.CompilerParams(
            dimension_semantics=("arbitrary",)),
    )(x_flat, wih_t, whh_t, b, wdec_t, bdec)

    return out_padded[:B, :NUM_CLASSES]


def lstm_reference(sentence, params):
    """Pure-JAX f32 reference for correctness checking."""
    emb_table, w_ih, w_hh, b_ih, b_hh, w_dec, b_dec = params
    x = jnp.take(emb_table, sentence, axis=0)  # (T, B, E)
    B = sentence.shape[1]
    h0 = jnp.zeros((B, HIDDEN), jnp.float32)
    c0 = jnp.zeros((B, HIDDEN), jnp.float32)
    H = HIDDEN

    def step(carry, x_t):
        h, c = carry
        gates = x_t @ w_ih.T + h @ w_hh.T + b_ih + b_hh
        i = jax.nn.sigmoid(gates[:, 0 * H:1 * H])
        f = jax.nn.sigmoid(gates[:, 1 * H:2 * H])
        g = jnp.tanh(gates[:, 2 * H:3 * H])
        o = jax.nn.sigmoid(gates[:, 3 * H:4 * H])
        c = f * c + i * g
        h = o * jnp.tanh(c)
        return (h, c), h

    (h, _), _ = jax.lax.scan(step, (h0, c0), x)
    return h @ w_dec.T + b_dec


def init_params(key):
    ks = jax.random.split(key, 7)
    emb_table = jax.random.normal(ks[0], (VOCAB, EMBED), jnp.float32) * 0.1
    # PyTorch nn.LSTM parameter shapes: weight_ih (4H, E), weight_hh (4H, H),
    # bias_ih (4H,), bias_hh (4H,)
    w_ih = jax.random.normal(ks[1], (4 * HIDDEN, EMBED), jnp.float32) * 0.05
    w_hh = jax.random.normal(ks[2], (4 * HIDDEN, HIDDEN), jnp.float32) * 0.05
    b_ih = jax.random.normal(ks[3], (4 * HIDDEN,), jnp.float32) * 0.05
    b_hh = jax.random.normal(ks[4], (4 * HIDDEN,), jnp.float32) * 0.05
    # nn.Linear(128, 6): weight (6, 128), bias (6,)
    w_dec = jax.random.normal(ks[5], (NUM_CLASSES, HIDDEN), jnp.float32) * 0.05
    b_dec = jax.random.normal(ks[6], (NUM_CLASSES,), jnp.float32) * 0.05
    return emb_table, w_ih, w_hh, b_ih, b_hh, w_dec, b_dec


if __name__ == "__main__":
    key = jax.random.PRNGKey(0)
    params = init_params(key)

    T, B = 8, 2  # seq_len=8, batch=2
    sentence = jax.random.randint(jax.random.PRNGKey(1), (T, B), 0, VOCAB,
                                  dtype=jnp.int32)

    out = lstm_forward(sentence, params)
    out = jax.block_until_ready(out)

    ref = lstm_reference(sentence, params)
    assert out.shape == (B, NUM_CLASSES)
    # bf16 MXU inputs vs. f32 reference -> loosened tolerance.
    assert jnp.allclose(out, ref, rtol=5e-2, atol=3e-2), (out, ref)

    print("KERNEL_OK")
</pallas_src>

<mosaic_0001>
module attributes {stable_mosaic.version = 11 : i64} {
  func.func @lstm_kernel(%arg0: i32, %arg1: memref<64x384xbf16, #tpu.memory_space<vmem>>, %arg2: memref<384x512xbf16, #tpu.memory_space<vmem>>, %arg3: memref<128x512xbf16, #tpu.memory_space<vmem>>, %arg4: memref<1x512xf32, #tpu.memory_space<vmem>>, %arg5: memref<128x128xbf16, #tpu.memory_space<vmem>>, %arg6: memref<1x128xf32, #tpu.memory_space<vmem>>, %arg7: memref<8x128xf32, #tpu.memory_space<vmem>>, %arg8: memref<64x512xf32, #tpu.memory_space<vmem>>, %arg9: memref<8x128xf32, #tpu.memory_space<vmem>>, %arg10: memref<8x128xf32, #tpu.memory_space<vmem>>) attributes {dimension_semantics = [#tpu.dimension_semantics<arbitrary>], iteration_bounds = array<i64: 1>, scalar_prefetch = 0 : i64, scratch_operands = 3 : i64, tpu.core_type = #tpu.core_type<tc>, window_params = [{pipeline_mode = #tpu.pipeline_mode<synchronous>, transform_indices = @transform_0, window_bounds = array<i64: 64, 384>}, {pipeline_mode = #tpu.pipeline_mode<synchronous>, transform_indices = @transform_1, window_bounds = array<i64: 384, 512>}, {pipeline_mode = #tpu.pipeline_mode<synchronous>, transform_indices = @transform_2, window_bounds = array<i64: 128, 512>}, {pipeline_mode = #tpu.pipeline_mode<synchronous>, transform_indices = @transform_3, window_bounds = array<i64: 1, 512>}, {pipeline_mode = #tpu.pipeline_mode<synchronous>, transform_indices = @transform_4, window_bounds = array<i64: 128, 128>}, {pipeline_mode = #tpu.pipeline_mode<synchronous>, transform_indices = @transform_5, window_bounds = array<i64: 1, 128>}, {pipeline_mode = #tpu.pipeline_mode<synchronous>, transform_indices = @transform_6, window_bounds = array<i64: 8, 128>}]} {
    %c0 = arith.constant 0 : index
    %c0_0 = arith.constant 0 : index
    %0 = vector.load %arg1[%c0, %c0_0] : memref<64x384xbf16, #tpu.memory_space<vmem>>, vector<64x384xbf16>
    %c0_1 = arith.constant 0 : index
    %c0_2 = arith.constant 0 : index
    %1 = vector.load %arg2[%c0_1, %c0_2] : memref<384x512xbf16, #tpu.memory_space<vmem>>, vector<384x512xbf16>
    %cst = arith.constant dense<0.000000e+00> : vector<64x512xf32>
    %2 = tpu.matmul %0, %1, %cst {dimension_numbers = #tpu.dot_dimension_numbers<[1], [0], [0], [1], [0, 0, 1, 1], [], []>} : vector<64x384xbf16>, vector<384x512xbf16>, vector<64x512xf32> -> vector<64x512xf32>
    %c0_3 = arith.constant 0 : index
    %c0_4 = arith.constant 0 : index
    %3 = vector.load %arg4[%c0_3, %c0_4] : memref<1x512xf32, #tpu.memory_space<vmem>>, vector<1x512xf32>
    %4 = vector.broadcast %3 : vector<1x512xf32> to vector<64x512xf32>
    %5 = arith.addf %2, %4 : vector<64x512xf32>
    %c0_5 = arith.constant 0 : index
    %c0_6 = arith.constant 0 : index
    %6 = vector.load %arg8[%c0_5, %c0_6] : memref<64x512xf32, #tpu.memory_space<vmem>>, vector<64x512xf32>
    tpu.vector_store %arg8[%c0_5, %c0_6], %5 {strides = array<i32>} : memref<64x512xf32, #tpu.memory_space<vmem>>, vector<64x512xf32>,
    %cst_7 = arith.constant 0.000000e+00 : f32
    %7 = vector.broadcast %cst_7 : f32 to vector<8x128xf32>
    %c0_8 = arith.constant 0 : index
    %c0_9 = arith.constant 0 : index
    %8 = vector.load %arg9[%c0_8, %c0_9] : memref<8x128xf32, #tpu.memory_space<vmem>>, vector<8x128xf32>
    tpu.vector_store %arg9[%c0_8, %c0_9], %7 {strides = array<i32>} : memref<8x128xf32, #tpu.memory_space<vmem>>, vector<8x128xf32>,
    %cst_10 = arith.constant 0.000000e+00 : f32
    %9 = vector.broadcast %cst_10 : f32 to vector<8x128xf32>
    %c0_11 = arith.constant 0 : index
    %c0_12 = arith.constant 0 : index
    %10 = vector.load %arg10[%c0_11, %c0_12] : memref<8x128xf32, #tpu.memory_space<vmem>>, vector<8x128xf32>
    tpu.vector_store %arg10[%c0_11, %c0_12], %9 {strides = array<i32>} : memref<8x128xf32, #tpu.memory_space<vmem>>, vector<8x128xf32>,
    %c0_i32 = arith.constant 0 : i32
    %c8_i32 = arith.constant 8 : i32
    %11 = arith.muli %c0_i32, %c8_i32 : i32
    %12 = tpu.assume_multiple %11, 8 : i32
    %13 = arith.index_cast %12 : i32 to index
    %c0_13 = arith.constant 0 : index
    %14 = vector.load %arg8[%13, %c0_13] : memref<64x512xf32, #tpu.memory_space<vmem>>, vector<8x512xf32>
    %c0_14 = arith.constant 0 : index
    %c0_15 = arith.constant 0 : index
    %15 = vector.load %arg9[%c0_14, %c0_15] : memref<8x128xf32, #tpu.memory_space<vmem>>, vector<8x128xf32>
    %16 = arith.truncf %15 : vector<8x128xf32> to vector<8x128xbf16>
    %c0_16 = arith.constant 0 : index
    %c0_17 = arith.constant 0 : index
    %17 = vector.load %arg3[%c0_16, %c0_17] : memref<128x512xbf16, #tpu.memory_space<vmem>>, vector<128x512xbf16>
    %cst_18 = arith.constant dense<0.000000e+00> : vector<8x512xf32>
    %18 = tpu.matmul %16, %17, %cst_18 {dimension_numbers = #tpu.dot_dimension_numbers<[1], [0], [0], [1], [0, 0, 1, 1], [], []>} : vector<8x128xbf16>, vector<128x512xbf16>, vector<8x512xf32> -> vector<8x512xf32>
    %19 = arith.addf %14, %18 : vector<8x512xf32>
    %20 = vector.extract_strided_slice %19 {offsets = [0, 0], sizes = [8, 128], strides = [1, 1]} : vector<8x512xf32> to vector<8x128xf32>
    %cst_19 = arith.constant 5.000000e-01 : f32
    %21 = vector.broadcast %cst_19 : f32 to vector<8x128xf32>
    %22 = arith.mulf %21, %20 : vector<8x128xf32>
    %23 = math.tanh %22 : vector<8x128xf32>
    %cst_20 = arith.constant 1.000000e+00 : f32
    %24 = vector.broadcast %cst_20 : f32 to vector<8x128xf32>
    %25 = arith.addf %23, %24 : vector<8x128xf32>
    %cst_21 = arith.constant 5.000000e-01 : f32
    %26 = vector.broadcast %cst_21 : f32 to vector<8x128xf32>
    %27 = arith.mulf %26, %25 : vector<8x128xf32>
    %28 = vector.extract_strided_slice %19 {offsets = [0, 128], sizes = [8, 128], strides = [1, 1]} : vector<8x512xf32> to vector<8x128xf32>
    %cst_22 = arith.constant 5.000000e-01 : f32
    %29 = vector.broadcast %cst_22 : f32 to vector<8x128xf32>
    %30 = arith.mulf %29, %28 : vector<8x128xf32>
    %31 = math.tanh %30 : vector<8x128xf32>
    %cst_23 = arith.constant 1.000000e+00 : f32
    %32 = vector.broadcast %cst_23 : f32 to vector<8x128xf32>
    %33 = arith.addf %31, %32 : vector<8x128xf32>
    %cst_24 = arith.constant 5.000000e-01 : f32
    %34 = vector.broadcast %cst_24 : f32 to vector<8x128xf32>
    %35 = arith.mulf %34, %33 : vector<8x128xf32>
    %36 = vector.extract_strided_slice %19 {offsets = [0, 256], sizes = [8, 128], strides = [1, 1]} : vector<8x512xf32> to vector<8x128xf32>
    %37 = math.tanh %36 : vector<8x128xf32>
    %38 = vector.extract_strided_slice %19 {offsets = [0, 384], sizes = [8, 128], strides = [1, 1]} : vector<8x512xf32> to vector<8x128xf32>
    %cst_25 = arith.constant 5.000000e-01 : f32
    %39 = vector.broadcast %cst_25 : f32 to vector<8x128xf32>
    %40 = arith.mulf %39, %38 : vector<8x128xf32>
    %41 = math.tanh %40 : vector<8x128xf32>
    %cst_26 = arith.constant 1.000000e+00 : f32
    %42 = vector.broadcast %cst_26 : f32 to vector<8x128xf32>
    %43 = arith.addf %41, %42 : vector<8x128xf32>
    %cst_27 = arith.constant 5.000000e-01 : f32
    %44 = vector.broadcast %cst_27 : f32 to vector<8x128xf32>
    %45 = arith.mulf %44, %43 : vector<8x128xf32>
    %c0_28 = arith.constant 0 : index
    %c0_29 = arith.constant 0 : index
    %46 = vector.load %arg10[%c0_28, %c0_29] : memref<8x128xf32, #tpu.memory_space<vmem>>, vector<8x128xf32>
    %47 = arith.mulf %35, %46 : vector<8x128xf32>
    %48 = arith.mulf %27, %37 : vector<8x128xf32>
    %49 = arith.addf %47, %48 : vector<8x128xf32>
    %50 = math.tanh %49 : vector<8x128xf32>
    %51 = arith.mulf %45, %50 : vector<8x128xf32>
    %c0_30 = arith.constant 0 : index
    %c0_31 = arith.constant 0 : index
    %52 = vector.load %arg9[%c0_30, %c0_31] : memref<8x128xf32, #tpu.memory_space<vmem>>, vector<8x128xf32>
    tpu.vector_store %arg9[%c0_30, %c0_31], %51 {strides = array<i32>} : memref<8x128xf32, #tpu.memory_space<vmem>>, vector<8x128xf32>,
    %c0_32 = arith.constant 0 : index
    %c0_33 = arith.constant 0 : index
    %53 = vector.load %arg10[%c0_32, %c0_33] : memref<8x128xf32, #tpu.memory_space<vmem>>, vector<8x128xf32>
    tpu.vector_store %arg10[%c0_32, %c0_33], %49 {strides = array<i32>} : memref<8x128xf32, #tpu.memory_space<vmem>>, vector<8x128xf32>,
    %c1_i32 = arith.constant 1 : i32
    %c8_i32_34 = arith.constant 8 : i32
    %54 = arith.muli %c1_i32, %c8_i32_34 : i32
    %55 = tpu.assume_multiple %54, 8 : i32
    %56 = arith.index_cast %55 : i32 to index
    %c0_35 = arith.constant 0 : index
    %57 = vector.load %arg8[%56, %c0_35] : memref<64x512xf32, #tpu.memory_space<vmem>>, vector<8x512xf32>
    %c0_36 = arith.constant 0 : index
    %c0_37 = arith.constant 0 : index
    %58 = vector.load %arg9[%c0_36, %c0_37] : memref<8x128xf32, #tpu.memory_space<vmem>>, vector<8x128xf32>
    %59 = arith.truncf %58 : vector<8x128xf32> to vector<8x128xbf16>
    %c0_38 = arith.constant 0 : index
    %c0_39 = arith.constant 0 : index
    %60 = vector.load %arg3[%c0_38, %c0_39] : memref<128x512xbf16, #tpu.memory_space<vmem>>, vector<128x512xbf16>
    %cst_40 = arith.constant dense<0.000000e+00> : vector<8x512xf32>
    %61 = tpu.matmul %59, %60, %cst_40 {dimension_numbers = #tpu.dot_dimension_numbers<[1], [0], [0], [1], [0, 0, 1, 1], [], []>} : vector<8x128xbf16>, vector<128x512xbf16>, vector<8x512xf32> -> vector<8x512xf32>
    %62 = arith.addf %57, %61 : vector<8x512xf32>
    %63 = vector.extract_strided_slice %62 {offsets = [0, 0], sizes = [8, 128], strides = [1, 1]} : vector<8x512xf32> to vector<8x128xf32>
    %cst_41 = arith.constant 5.000000e-01 : f32
    %64 = vector.broadcast %cst_41 : f32 to vector<8x128xf32>
    %65 = arith.mulf %64, %63 : vector<8x128xf32>
    %66 = math.tanh %65 : vector<8x128xf32>
    %cst_42 = arith.constant 1.000000e+00 : f32
    %67 = vector.broadcast %cst_42 : f32 to vector<8x128xf32>
    %68 = arith.addf %66, %67 : vector<8x128xf32>
    %cst_43 = arith.constant 5.000000e-01 : f32
    %69 = vector.broadcast %cst_43 : f32 to vector<8x128xf32>
    %70 = arith.mulf %69, %68 : vector<8x128xf32>
    %71 = vector.extract_strided_slice %62 {offsets = [0, 128], sizes = [8, 128], strides = [1, 1]} : vector<8x512xf32> to vector<8x128xf32>
    %cst_44 = arith.constant 5.000000e-01 : f32
    %72 = vector.broadcast %cst_44 : f32 to vector<8x128xf32>
    %73 = arith.mulf %72, %71 : vector<8x128xf32>
    %74 = math.tanh %73 : vector<8x128xf32>
    %cst_45 = arith.constant 1.000000e+00 : f32
    %75 = vector.broadcast %cst_45 : f32 to vector<8x128xf32>
    %76 = arith.addf %74, %75 : vector<8x128xf32>
    %cst_46 = arith.constant 5.000000e-01 : f32
    %77 = vector.broadcast %cst_46 : f32 to vector<8x128xf32>
    %78 = arith.mulf %77, %76 : vector<8x128xf32>
    %79 = vector.extract_strided_slice %62 {offsets = [0, 256], sizes = [8, 128], strides = [1, 1]} : vector<8x512xf32> to vector<8x128xf32>
    %80 = math.tanh %79 : vector<8x128xf32>
    %81 = vector.extract_strided_slice %62 {offsets = [0, 384], sizes = [8, 128], strides = [1, 1]} : vector<8x512xf32> to vector<8x128xf32>
    %cst_47 = arith.constant 5.000000e-01 : f32
    %82 = vector.broadcast %cst_47 : f32 to vector<8x128xf32>
    %83 = arith.mulf %82, %81 : vector<8x128xf32>
    %84 = math.tanh %83 : vector<8x128xf32>
    %cst_48 = arith.constant 1.000000e+00 : f32
    %85 = vector.broadcast %cst_48 : f32 to vector<8x128xf32>
    %86 = arith.addf %84, %85 : vector<8x128xf32>
    %cst_49 = arith.constant 5.000000e-01 : f32
    %87 = vector.broadcast %cst_49 : f32 to vector<8x128xf32>
    %88 = arith.mulf %87, %86 : vector<8x128xf32>
    %c0_50 = arith.constant 0 : index
    %c0_51 = arith.constant 0 : index
    %89 = vector.load %arg10[%c0_50, %c0_51] : memref<8x128xf32, #tpu.memory_space<vmem>>, vector<8x128xf32>
    %90 = arith.mulf %78, %89 : vector<8x128xf32>
    %91 = arith.mulf %70, %80 : vector<8x128xf32>
    %92 = arith.addf %90, %91 : vector<8x128xf32>
    %93 = math.tanh %92 : vector<8x128xf32>
    %94 = arith.mulf %88, %93 : vector<8x128xf32>
    %c0_52 = arith.constant 0 : index
    %c0_53 = arith.constant 0 : index
    %95 = vector.load %arg9[%c0_52, %c0_53] : memref<8x128xf32, #tpu.memory_space<vmem>>, vector<8x128xf32>
    tpu.vector_store %arg9[%c0_52, %c0_53], %94 {strides = array<i32>} : memref<8x128xf32, #tpu.memory_space<vmem>>, vector<8x128xf32>,
    %c0_54 = arith.constant 0 : index
    %c0_55 = arith.constant 0 : index
    %96 = vector.load %arg10[%c0_54, %c0_55] : memref<8x128xf32, #tpu.memory_space<vmem>>, vector<8x128xf32>
    tpu.vector_store %arg10[%c0_54, %c0_55], %92 {strides = array<i32>} : memref<8x128xf32, #tpu.memory_space<vmem>>, vector<8x128xf32>,
    %c2_i32 = arith.constant 2 : i32
    %c8_i32_56 = arith.constant 8 : i32
    %97 = arith.muli %c2_i32, %c8_i32_56 : i32
    %98 = tpu.assume_multiple %97, 8 : i32
    %99 = arith.index_cast %98 : i32 to index
    %c0_57 = arith.constant 0 : index
    %100 = vector.load %arg8[%99, %c0_57] : memref<64x512xf32, #tpu.memory_space<vmem>>, vector<8x512xf32>
    %c0_58 = arith.constant 0 : index
    %c0_59 = arith.constant 0 : index
    %101 = vector.load %arg9[%c0_58, %c0_59] : memref<8x128xf32, #tpu.memory_space<vmem>>, vector<8x128xf32>
    %102 = arith.truncf %101 : vector<8x128xf32> to vector<8x128xbf16>
    %c0_60 = arith.constant 0 : index
    %c0_61 = arith.constant 0 : index
    %103 = vector.load %arg3[%c0_60, %c0_61] : memref<128x512xbf16, #tpu.memory_space<vmem>>, vector<128x512xbf16>
    %cst_62 = arith.constant dense<0.000000e+00> : vector<8x512xf32>
    %104 = tpu.matmul %102, %103, %cst_62 {dimension_numbers = #tpu.dot_dimension_numbers<[1], [0], [0], [1], [0, 0, 1, 1], [], []>} : vector<8x128xbf16>, vector<128x512xbf16>, vector<8x512xf32> -> vector<8x512xf32>
    %105 = arith.addf %100, %104 : vector<8x512xf32>
    %106 = vector.extract_strided_slice %105 {offsets = [0, 0], sizes = [8, 128], strides = [1, 1]} : vector<8x512xf32> to vector<8x128xf32>
    %cst_63 = arith.constant 5.000000e-01 : f32
    %107 = vector.broadcast %cst_63 : f32 to vector<8x128xf32>
    %108 = arith.mulf %107, %106 : vector<8x128xf32>
    %109 = math.tanh %108 : vector<8x128xf32>
    %cst_64 = arith.constant 1.000000e+00 : f32
    %110 = vector.broadcast %cst_64 : f32 to vector<8x128xf32>
    %111 = arith.addf %109, %110 : vector<8x128xf32>
    %cst_65 = arith.constant 5.000000e-01 : f32
    %112 = vector.broadcast %cst_65 : f32 to vector<8x128xf32>
    %113 = arith.mulf %112, %111 : vector<8x128xf32>
    %114 = vector.extract_strided_slice %105 {offsets = [0, 128], sizes = [8, 128], strides = [1, 1]} : vector<8x512xf32> to vector<8x128xf32>
    %cst_66 = arith.constant 5.000000e-01 : f32
    %115 = vector.broadcast %cst_66 : f32 to vector<8x128xf32>
    %116 = arith.mulf %115, %114 : vector<8x128xf32>
    %117 = math.tanh %116 : vector<8x128xf32>
    %cst_67 = arith.constant 1.000000e+00 : f32
    %118 = vector.broadcast %cst_67 : f32 to vector<8x128xf32>
    %119 = arith.addf %117, %118 : vector<8x128xf32>
    %cst_68 = arith.constant 5.000000e-01 : f32
    %120 = vector.broadcast %cst_68 : f32 to vector<8x128xf32>
    %121 = arith.mulf %120, %119 : vector<8x128xf32>
    %122 = vector.extract_strided_slice %105 {offsets = [0, 256], sizes = [8, 128], strides = [1, 1]} : vector<8x512xf32> to vector<8x128xf32>
    %123 = math.tanh %122 : vector<8x128xf32>
    %124 = vector.extract_strided_slice %105 {offsets = [0, 384], sizes = [8, 128], strides = [1, 1]} : vector<8x512xf32> to vector<8x128xf32>
    %cst_69 = arith.constant 5.000000e-01 : f32
    %125 = vector.broadcast %cst_69 : f32 to vector<8x128xf32>
    %126 = arith.mulf %125, %124 : vector<8x128xf32>
    %127 = math.tanh %126 : vector<8x128xf32>
    %cst_70 = arith.constant 1.000000e+00 : f32
    %128 = vector.broadcast %cst_70 : f32 to vector<8x128xf32>
    %129 = arith.addf %127, %128 : vector<8x128xf32>
    %cst_71 = arith.constant 5.000000e-01 : f32
    %130 = vector.broadcast %cst_71 : f32 to vector<8x128xf32>
    %131 = arith.mulf %130, %129 : vector<8x128xf32>
    %c0_72 = arith.constant 0 : index
    %c0_73 = arith.constant 0 : index
    %132 = vector.load %arg10[%c0_72, %c0_73] : memref<8x128xf32, #tpu.memory_space<vmem>>, vector<8x128xf32>
    %133 = arith.mulf %121, %132 : vector<8x128xf32>
    %134 = arith.mulf %113, %123 : vector<8x128xf32>
    %135 = arith.addf %133, %134 : vector<8x128xf32>
    %136 = math.tanh %135 : vector<8x128xf32>
    %137 = arith.mulf %131, %136 : vector<8x128xf32>
    %c0_74 = arith.constant 0 : index
    %c0_75 = arith.constant 0 : index
    %138 = vector.load %arg9[%c0_74, %c0_75] : memref<8x128xf32, #tpu.memory_space<vmem>>, vector<8x128xf32>
    tpu.vector_store %arg9[%c0_74, %c0_75], %137 {strides = array<i32>} : memref<8x128xf32, #tpu.memory_space<vmem>>, vector<8x128xf32>,
    %c0_76 = arith.constant 0 : index
    %c0_77 = arith.constant 0 : index
    %139 = vector.load %arg10[%c0_76, %c0_77] : memref<8x128xf32, #tpu.memory_space<vmem>>, vector<8x128xf32>
    tpu.vector_store %arg10[%c0_76, %c0_77], %135 {strides = array<i32>} : memref<8x128xf32, #tpu.memory_space<vmem>>, vector<8x128xf32>,
    %c3_i32 = arith.constant 3 : i32
    %c8_i32_78 = arith.constant 8 : i32
    %140 = arith.muli %c3_i32, %c8_i32_78 : i32
    %141 = tpu.assume_multiple %140, 8 : i32
    %142 = arith.index_cast %141 : i32 to index
    %c0_79 = arith.constant 0 : index
    %143 = vector.load %arg8[%142, %c0_79] : memref<64x512xf32, #tpu.memory_space<vmem>>, vector<8x512xf32>
    %c0_80 = arith.constant 0 : index
    %c0_81 = arith.constant 0 : index
    %144 = vector.load %arg9[%c0_80, %c0_81] : memref<8x128xf32, #tpu.memory_space<vmem>>, vector<8x128xf32>
    %145 = arith.truncf %144 : vector<8x128xf32> to vector<8x128xbf16>
    %c0_82 = arith.constant 0 : index
    %c0_83 = arith.constant 0 : index
    %146 = vector.load %arg3[%c0_82, %c0_83] : memref<128x512xbf16, #tpu.memory_space<vmem>>, vector<128x512xbf16>
    %cst_84 = arith.constant dense<0.000000e+00> : vector<8x512xf32>
    %147 = tpu.matmul %145, %146, %cst_84 {dimension_numbers = #tpu.dot_dimension_numbers<[1], [0], [0], [1], [0, 0, 1, 1], [], []>} : vector<8x128xbf16>, vector<128x512xbf16>, vector<8x512xf32> -> vector<8x512xf32>
    %148 = arith.addf %143, %147 : vector<8x512xf32>
    %149 = vector.extract_strided_slice %148 {offsets = [0, 0], sizes = [8, 128], strides = [1, 1]} : vector<8x512xf32> to vector<8x128xf32>
    %cst_85 = arith.constant 5.000000e-01 : f32
    %150 = vector.broadcast %cst_85 : f32 to vector<8x128xf32>
    %151 = arith.mulf %150, %149 : vector<8x128xf32>
    %152 = math.tanh %151 : vector<8x128xf32>
    %cst_86 = arith.constant 1.000000e+00 : f32
    %153 = vector.broadcast %cst_86 : f32 to vector<8x128xf32>
    %154 = arith.addf %152, %153 : vector<8x128xf32>
    %cst_87 = arith.constant 5.000000e-01 : f32
    %155 = vector.broadcast %cst_87 : f32 to vector<8x128xf32>
    %156 = arith.mulf %155, %154 : vector<8x128xf32>
    %157 = vector.extract_strided_slice %148 {offsets = [0, 128], sizes = [8, 128], strides = [1, 1]} : vector<8x512xf32> to vector<8x128xf32>
    %cst_88 = arith.constant 5.000000e-01 : f32
    %158 = vector.broadcast %cst_88 : f32 to vector<8x128xf32>
    %159 = arith.mulf %158, %157 : vector<8x128xf32>
    %160 = math.tanh %159 : vector<8x128xf32>
    %cst_89 = arith.constant 1.000000e+00 : f32
    %161 = vector.broadcast %cst_89 : f32 to vector<8x128xf32>
    %162 = arith.addf %160, %161 : vector<8x128xf32>
    %cst_90 = arith.constant 5.000000e-01 : f32
    %163 = vector.broadcast %cst_90 : f32 to vector<8x128xf32>
    %164 = arith.mulf %163, %162 : vector<8x128xf32>
    %165 = vector.extract_strided_slice %148 {offsets = [0, 256], sizes = [8, 128], strides = [1, 1]} : vector<8x512xf32> to vector<8x128xf32>
    %166 = math.tanh %165 : vector<8x128xf32>
    %167 = vector.extract_strided_slice %148 {offsets = [0, 384], sizes = [8, 128], strides = [1, 1]} : vector<8x512xf32> to vector<8x128xf32>
    %cst_91 = arith.constant 5.000000e-01 : f32
    %168 = vector.broadcast %cst_91 : f32 to vector<8x128xf32>
    %169 = arith.mulf %168, %167 : vector<8x128xf32>
    %170 = math.tanh %169 : vector<8x128xf32>
    %cst_92 = arith.constant 1.000000e+00 : f32
    %171 = vector.broadcast %cst_92 : f32 to vector<8x128xf32>
    %172 = arith.addf %170, %171 : vector<8x128xf32>
    %cst_93 = arith.constant 5.000000e-01 : f32
    %173 = vector.broadcast %cst_93 : f32 to vector<8x128xf32>
    %174 = arith.mulf %173, %172 : vector<8x128xf32>
    %c0_94 = arith.constant 0 : index
    %c0_95 = arith.constant 0 : index
    %175 = vector.load %arg10[%c0_94, %c0_95] : memref<8x128xf32, #tpu.memory_space<vmem>>, vector<8x128xf32>
    %176 = arith.mulf %164, %175 : vector<8x128xf32>
    %177 = arith.mulf %156, %166 : vector<8x128xf32>
    %178 = arith.addf %176, %177 : vector<8x128xf32>
    %179 = math.tanh %178 : vector<8x128xf32>
    %180 = arith.mulf %174, %179 : vector<8x128xf32>
    %c0_96 = arith.constant 0 : index
    %c0_97 = arith.constant 0 : index
    %181 = vector.load %arg9[%c0_96, %c0_97] : memref<8x128xf32, #tpu.memory_space<vmem>>, vector<8x128xf32>
    tpu.vector_store %arg9[%c0_96, %c0_97], %180 {strides = array<i32>} : memref<8x128xf32, #tpu.memory_space<vmem>>, vector<8x128xf32>,
    %c0_98 = arith.constant 0 : index
    %c0_99 = arith.constant 0 : index
    %182 = vector.load %arg10[%c0_98, %c0_99] : memref<8x128xf32, #tpu.memory_space<vmem>>, vector<8x128xf32>
    tpu.vector_store %arg10[%c0_98, %c0_99], %178 {strides = array<i32>} : memref<8x128xf32, #tpu.memory_space<vmem>>, vector<8x128xf32>,
    %c4_i32 = arith.constant 4 : i32
    %c8_i32_100 = arith.constant 8 : i32
    %183 = arith.muli %c4_i32, %c8_i32_100 : i32
    %184 = tpu.assume_multiple %183, 8 : i32
    %185 = arith.index_cast %184 : i32 to index
    %c0_101 = arith.constant 0 : index
    %186 = vector.load %arg8[%185, %c0_101] : memref<64x512xf32, #tpu.memory_space<vmem>>, vector<8x512xf32>
    %c0_102 = arith.constant 0 : index
    %c0_103 = arith.constant 0 : index
    %187 = vector.load %arg9[%c0_102, %c0_103] : memref<8x128xf32, #tpu.memory_space<vmem>>, vector<8x128xf32>
    %188 = arith.truncf %187 : vector<8x128xf32> to vector<8x128xbf16>
    %c0_104 = arith.constant 0 : index
    %c0_105 = arith.constant 0 : index
    %189 = vector.load %arg3[%c0_104, %c0_105] : memref<128x512xbf16, #tpu.memory_space<vmem>>, vector<128x512xbf16>
    %cst_106 = arith.constant dense<0.000000e+00> : vector<8x512xf32>
    %190 = tpu.matmul %188, %189, %cst_106 {dimension_numbers = #tpu.dot_dimension_numbers<[1], [0], [0], [1], [0, 0, 1, 1], [], []>} : vector<8x128xbf16>, vector<128x512xbf16>, vector<8x512xf32> -> vector<8x512xf32>
    %191 = arith.addf %186, %190 : vector<8x512xf32>
    %192 = vector.extract_strided_slice %191 {offsets = [0, 0], sizes = [8, 128], strides = [1, 1]} : vector<8x512xf32> to vector<8x128xf32>
    %cst_107 = arith.constant 5.000000e-01 : f32
    %193 = vector.broadcast %cst_107 : f32 to vector<8x128xf32>
    %194 = arith.mulf %193, %192 : vector<8x128xf32>
    %195 = math.tanh %194 : vector<8x128xf32>
    %cst_108 = arith.constant 1.000000e+00 : f32
    %196 = vector.broadcast %cst_108 : f32 to vector<8x128xf32>
    %197 = arith.addf %195, %196 : vector<8x128xf32>
    %cst_109 = arith.constant 5.000000e-01 : f32
    %198 = vector.broadcast %cst_109 : f32 to vector<8x128xf32>
    %199 = arith.mulf %198, %197 : vector<8x128xf32>
    %200 = vector.extract_strided_slice %191 {offsets = [0, 128], sizes = [8, 128], strides = [1, 1]} : vector<8x512xf32> to vector<8x128xf32>
    %cst_110 = arith.constant 5.000000e-01 : f32
    %201 = vector.broadcast %cst_110 : f32 to vector<8x128xf32>
    %202 = arith.mulf %201, %200 : vector<8x128xf32>
    %203 = math.tanh %202 : vector<8x128xf32>
    %cst_111 = arith.constant 1.000000e+00 : f32
    %204 = vector.broadcast %cst_111 : f32 to vector<8x128xf32>
    %205 = arith.addf %203, %204 : vector<8x128xf32>
    %cst_112 = arith.constant 5.000000e-01 : f32
    %206 = vector.broadcast %cst_112 : f32 to vector<8x128xf32>
    %207 = arith.mulf %206, %205 : vector<8x128xf32>
    %208 = vector.extract_strided_slice %191 {offsets = [0, 256], sizes = [8, 128], strides = [1, 1]} : vector<8x512xf32> to vector<8x128xf32>
    %209 = math.tanh %208 : vector<8x128xf32>
    %210 = vector.extract_strided_slice %191 {offsets = [0, 384], sizes = [8, 128], strides = [1, 1]} : vector<8x512xf32> to vector<8x128xf32>
    %cst_113 = arith.constant 5.000000e-01 : f32
    %211 = vector.broadcast %cst_113 : f32 to vector<8x128xf32>
    %212 = arith.mulf %211, %210 : vector<8x128xf32>
    %213 = math.tanh %212 : vector<8x128xf32>
    %cst_114 = arith.constant 1.000000e+00 : f32
    %214 = vector.broadcast %cst_114 : f32 to vector<8x128xf32>
    %215 = arith.addf %213, %214 : vector<8x128xf32>
    %cst_115 = arith.constant 5.000000e-01 : f32
    %216 = vector.broadcast %cst_115 : f32 to vector<8x128xf32>
    %217 = arith.mulf %216, %215 : vector<8x128xf32>
    %c0_116 = arith.constant 0 : index
    %c0_117 = arith.constant 0 : index
    %218 = vector.load %arg10[%c0_116, %c0_117] : memref<8x128xf32, #tpu.memory_space<vmem>>, vector<8x128xf32>
    %219 = arith.mulf %207, %218 : vector<8x128xf32>
    %220 = arith.mulf %199, %209 : vector<8x128xf32>
    %221 = arith.addf %219, %220 : vector<8x128xf32>
    %222 = math.tanh %221 : vector<8x128xf32>
    %223 = arith.mulf %217, %222 : vector<8x128xf32>
    %c0_118 = arith.constant 0 : index
    %c0_119 = arith.constant 0 : index
    %224 = vector.load %arg9[%c0_118, %c0_119] : memref<8x128xf32, #tpu.memory_space<vmem>>, vector<8x128xf32>
    tpu.vector_store %arg9[%c0_118, %c0_119], %223 {strides = array<i32>} : memref<8x128xf32, #tpu.memory_space<vmem>>, vector<8x128xf32>,
    %c0_120 = arith.constant 0 : index
    %c0_121 = arith.constant 0 : index
    %225 = vector.load %arg10[%c0_120, %c0_121] : memref<8x128xf32, #tpu.memory_space<vmem>>, vector<8x128xf32>
    tpu.vector_store %arg10[%c0_120, %c0_121], %221 {strides = array<i32>} : memref<8x128xf32, #tpu.memory_space<vmem>>, vector<8x128xf32>,
    %c5_i32 = arith.constant 5 : i32
    %c8_i32_122 = arith.constant 8 : i32
    %226 = arith.muli %c5_i32, %c8_i32_122 : i32
    %227 = tpu.assume_multiple %226, 8 : i32
    %228 = arith.index_cast %227 : i32 to index
    %c0_123 = arith.constant 0 : index
    %229 = vector.load %arg8[%228, %c0_123] : memref<64x512xf32, #tpu.memory_space<vmem>>, vector<8x512xf32>
    %c0_124 = arith.constant 0 : index
    %c0_125 = arith.constant 0 : index
    %230 = vector.load %arg9[%c0_124, %c0_125] : memref<8x128xf32, #tpu.memory_space<vmem>>, vector<8x128xf32>
    %231 = arith.truncf %230 : vector<8x128xf32> to vector<8x128xbf16>
    %c0_126 = arith.constant 0 : index
    %c0_127 = arith.constant 0 : index
    %232 = vector.load %arg3[%c0_126, %c0_127] : memref<128x512xbf16, #tpu.memory_space<vmem>>, vector<128x512xbf16>
    %cst_128 = arith.constant dense<0.000000e+00> : vector<8x512xf32>
    %233 = tpu.matmul %231, %232, %cst_128 {dimension_numbers = #tpu.dot_dimension_numbers<[1], [0], [0], [1], [0, 0, 1, 1], [], []>} : vector<8x128xbf16>, vector<128x512xbf16>, vector<8x512xf32> -> vector<8x512xf32>
    %234 = arith.addf %229, %233 : vector<8x512xf32>
    %235 = vector.extract_strided_slice %234 {offsets = [0, 0], sizes = [8, 128], strides = [1, 1]} : vector<8x512xf32> to vector<8x128xf32>
    %cst_129 = arith.constant 5.000000e-01 : f32
    %236 = vector.broadcast %cst_129 : f32 to vector<8x128xf32>
    %237 = arith.mulf %236, %235 : vector<8x128xf32>
    %238 = math.tanh %237 : vector<8x128xf32>
    %cst_130 = arith.constant 1.000000e+00 : f32
    %239 = vector.broadcast %cst_130 : f32 to vector<8x128xf32>
    %240 = arith.addf %238, %239 : vector<8x128xf32>
    %cst_131 = arith.constant 5.000000e-01 : f32
    %241 = vector.broadcast %cst_131 : f32 to vector<8x128xf32>
    %242 = arith.mulf %241, %240 : vector<8x128xf32>
    %243 = vector.extract_strided_slice %234 {offsets = [0, 128], sizes = [8, 128], strides = [1, 1]} : vector<8x512xf32> to vector<8x128xf32>
    %cst_132 = arith.constant 5.000000e-01 : f32
    %244 = vector.broadcast %cst_132 : f32 to vector<8x128xf32>
    %245 = arith.mulf %244, %243 : vector<8x128xf32>
    %246 = math.tanh %245 : vector<8x128xf32>
    %cst_133 = arith.constant 1.000000e+00 : f32
    %247 = vector.broadcast %cst_133 : f32 to vector<8x128xf32>
    %248 = arith.addf %246, %247 : vector<8x128xf32>
    %cst_134 = arith.constant 5.000000e-01 : f32
    %249 = vector.broadcast %cst_134 : f32 to vector<8x128xf32>
    %250 = arith.mulf %249, %248 : vector<8x128xf32>
    %251 = vector.extract_strided_slice %234 {offsets = [0, 256], sizes = [8, 128], strides = [1, 1]} : vector<8x512xf32> to vector<8x128xf32>
    %252 = math.tanh %251 : vector<8x128xf32>
    %253 = vector.extract_strided_slice %234 {offsets = [0, 384], sizes = [8, 128], strides = [1, 1]} : vector<8x512xf32> to vector<8x128xf32>
    %cst_135 = arith.constant 5.000000e-01 : f32
    %254 = vector.broadcast %cst_135 : f32 to vector<8x128xf32>
    %255 = arith.mulf %254, %253 : vector<8x128xf32>
    %256 = math.tanh %255 : vector<8x128xf32>
    %cst_136 = arith.constant 1.000000e+00 : f32
    %257 = vector.broadcast %cst_136 : f32 to vector<8x128xf32>
    %258 = arith.addf %256, %257 : vector<8x128xf32>
    %cst_137 = arith.constant 5.000000e-01 : f32
    %259 = vector.broadcast %cst_137 : f32 to vector<8x128xf32>
    %260 = arith.mulf %259, %258 : vector<8x128xf32>
    %c0_138 = arith.constant 0 : index
    %c0_139 = arith.constant 0 : index
    %261 = vector.load %arg10[%c0_138, %c0_139] : memref<8x128xf32, #tpu.memory_space<vmem>>, vector<8x128xf32>
    %262 = arith.mulf %250, %261 : vector<8x128xf32>
    %263 = arith.mulf %242, %252 : vector<8x128xf32>
    %264 = arith.addf %262, %263 : vector<8x128xf32>
    %265 = math.tanh %264 : vector<8x128xf32>
    %266 = arith.mulf %260, %265 : vector<8x128xf32>
    %c0_140 = arith.constant 0 : index
    %c0_141 = arith.constant 0 : index
    %267 = vector.load %arg9[%c0_140, %c0_141] : memref<8x128xf32, #tpu.memory_space<vmem>>, vector<8x128xf32>
    tpu.vector_store %arg9[%c0_140, %c0_141], %266 {strides = array<i32>} : memref<8x128xf32, #tpu.memory_space<vmem>>, vector<8x128xf32>,
    %c0_142 = arith.constant 0 : index
    %c0_143 = arith.constant 0 : index
    %268 = vector.load %arg10[%c0_142, %c0_143] : memref<8x128xf32, #tpu.memory_space<vmem>>, vector<8x128xf32>
    tpu.vector_store %arg10[%c0_142, %c0_143], %264 {strides = array<i32>} : memref<8x128xf32, #tpu.memory_space<vmem>>, vector<8x128xf32>,
    %c6_i32 = arith.constant 6 : i32
    %c8_i32_144 = arith.constant 8 : i32
    %269 = arith.muli %c6_i32, %c8_i32_144 : i32
    %270 = tpu.assume_multiple %269, 8 : i32
    %271 = arith.index_cast %270 : i32 to index
    %c0_145 = arith.constant 0 : index
    %272 = vector.load %arg8[%271, %c0_145] : memref<64x512xf32, #tpu.memory_space<vmem>>, vector<8x512xf32>
    %c0_146 = arith.constant 0 : index
    %c0_147 = arith.constant 0 : index
    %273 = vector.load %arg9[%c0_146, %c0_147] : memref<8x128xf32, #tpu.memory_space<vmem>>, vector<8x128xf32>
    %274 = arith.truncf %273 : vector<8x128xf32> to vector<8x128xbf16>
    %c0_148 = arith.constant 0 : index
    %c0_149 = arith.constant 0 : index
    %275 = vector.load %arg3[%c0_148, %c0_149] : memref<128x512xbf16, #tpu.memory_space<vmem>>, vector<128x512xbf16>
    %cst_150 = arith.constant dense<0.000000e+00> : vector<8x512xf32>
    %276 = tpu.matmul %274, %275, %cst_150 {dimension_numbers = #tpu.dot_dimension_numbers<[1], [0], [0], [1], [0, 0, 1, 1], [], []>} : vector<8x128xbf16>, vector<128x512xbf16>, vector<8x512xf32> -> vector<8x512xf32>
    %277 = arith.addf %272, %276 : vector<8x512xf32>
    %278 = vector.extract_strided_slice %277 {offsets = [0, 0], sizes = [8, 128], strides = [1, 1]} : vector<8x512xf32> to vector<8x128xf32>
    %cst_151 = arith.constant 5.000000e-01 : f32
    %279 = vector.broadcast %cst_151 : f32 to vector<8x128xf32>
    %280 = arith.mulf %279, %278 : vector<8x128xf32>
    %281 = math.tanh %280 : vector<8x128xf32>
    %cst_152 = arith.constant 1.000000e+00 : f32
    %282 = vector.broadcast %cst_152 : f32 to vector<8x128xf32>
    %283 = arith.addf %281, %282 : vector<8x128xf32>
    %cst_153 = arith.constant 5.000000e-01 : f32
    %284 = vector.broadcast %cst_153 : f32 to vector<8x128xf32>
    %285 = arith.mulf %284, %283 : vector<8x128xf32>
    %286 = vector.extract_strided_slice %277 {offsets = [0, 128], sizes = [8, 128], strides = [1, 1]} : vector<8x512xf32> to vector<8x128xf32>
    %cst_154 = arith.constant 5.000000e-01 : f32
    %287 = vector.broadcast %cst_154 : f32 to vector<8x128xf32>
    %288 = arith.mulf %287, %286 : vector<8x128xf32>
    %289 = math.tanh %288 : vector<8x128xf32>
    %cst_155 = arith.constant 1.000000e+00 : f32
    %290 = vector.broadcast %cst_155 : f32 to vector<8x128xf32>
    %291 = arith.addf %289, %290 : vector<8x128xf32>
    %cst_156 = arith.constant 5.000000e-01 : f32
    %292 = vector.broadcast %cst_156 : f32 to vector<8x128xf32>
    %293 = arith.mulf %292, %291 : vector<8x128xf32>
    %294 = vector.extract_strided_slice %277 {offsets = [0, 256], sizes = [8, 128], strides = [1, 1]} : vector<8x512xf32> to vector<8x128xf32>
    %295 = math.tanh %294 : vector<8x128xf32>
    %296 = vector.extract_strided_slice %277 {offsets = [0, 384], sizes = [8, 128], strides = [1, 1]} : vector<8x512xf32> to vector<8x128xf32>
    %cst_157 = arith.constant 5.000000e-01 : f32
    %297 = vector.broadcast %cst_157 : f32 to vector<8x128xf32>
    %298 = arith.mulf %297, %296 : vector<8x128xf32>
    %299 = math.tanh %298 : vector<8x128xf32>
    %cst_158 = arith.constant 1.000000e+00 : f32
    %300 = vector.broadcast %cst_158 : f32 to vector<8x128xf32>
    %301 = arith.addf %299, %300 : vector<8x128xf32>
    %cst_159 = arith.constant 5.000000e-01 : f32
    %302 = vector.broadcast %cst_159 : f32 to vector<8x128xf32>
    %303 = arith.mulf %302, %301 : vector<8x128xf32>
    %c0_160 = arith.constant 0 : index
    %c0_161 = arith.constant 0 : index
    %304 = vector.load %arg10[%c0_160, %c0_161] : memref<8x128xf32, #tpu.memory_space<vmem>>, vector<8x128xf32>
    %305 = arith.mulf %293, %304 : vector<8x128xf32>
    %306 = arith.mulf %285, %295 : vector<8x128xf32>
    %307 = arith.addf %305, %306 : vector<8x128xf32>
    %308 = math.tanh %307 : vector<8x128xf32>
    %309 = arith.mulf %303, %308 : vector<8x128xf32>
    %c0_162 = arith.constant 0 : index
    %c0_163 = arith.constant 0 : index
    %310 = vector.load %arg9[%c0_162, %c0_163] : memref<8x128xf32, #tpu.memory_space<vmem>>, vector<8x128xf32>
    tpu.vector_store %arg9[%c0_162, %c0_163], %309 {strides = array<i32>} : memref<8x128xf32, #tpu.memory_space<vmem>>, vector<8x128xf32>,
    %c0_164 = arith.constant 0 : index
    %c0_165 = arith.constant 0 : index
    %311 = vector.load %arg10[%c0_164, %c0_165] : memref<8x128xf32, #tpu.memory_space<vmem>>, vector<8x128xf32>
    tpu.vector_store %arg10[%c0_164, %c0_165], %307 {strides = array<i32>} : memref<8x128xf32, #tpu.memory_space<vmem>>, vector<8x128xf32>,
    %c7_i32 = arith.constant 7 : i32
    %c8_i32_166 = arith.constant 8 : i32
    %312 = arith.muli %c7_i32, %c8_i32_166 : i32
    %313 = tpu.assume_multiple %312, 8 : i32
    %314 = arith.index_cast %313 : i32 to index
    %c0_167 = arith.constant 0 : index
    %315 = vector.load %arg8[%314, %c0_167] : memref<64x512xf32, #tpu.memory_space<vmem>>, vector<8x512xf32>
    %c0_168 = arith.constant 0 : index
    %c0_169 = arith.constant 0 : index
    %316 = vector.load %arg9[%c0_168, %c0_169] : memref<8x128xf32, #tpu.memory_space<vmem>>, vector<8x128xf32>
    %317 = arith.truncf %316 : vector<8x128xf32> to vector<8x128xbf16>
    %c0_170 = arith.constant 0 : index
    %c0_171 = arith.constant 0 : index
    %318 = vector.load %arg3[%c0_170, %c0_171] : memref<128x512xbf16, #tpu.memory_space<vmem>>, vector<128x512xbf16>
    %cst_172 = arith.constant dense<0.000000e+00> : vector<8x512xf32>
    %319 = tpu.matmul %317, %318, %cst_172 {dimension_numbers = #tpu.dot_dimension_numbers<[1], [0], [0], [1], [0, 0, 1, 1], [], []>} : vector<8x128xbf16>, vector<128x512xbf16>, vector<8x512xf32> -> vector<8x512xf32>
    %320 = arith.addf %315, %319 : vector<8x512xf32>
    %321 = vector.extract_strided_slice %320 {offsets = [0, 0], sizes = [8, 128], strides = [1, 1]} : vector<8x512xf32> to vector<8x128xf32>
    %cst_173 = arith.constant 5.000000e-01 : f32
    %322 = vector.broadcast %cst_173 : f32 to vector<8x128xf32>
    %323 = arith.mulf %322, %321 : vector<8x128xf32>
    %324 = math.tanh %323 : vector<8x128xf32>
    %cst_174 = arith.constant 1.000000e+00 : f32
    %325 = vector.broadcast %cst_174 : f32 to vector<8x128xf32>
    %326 = arith.addf %324, %325 : vector<8x128xf32>
    %cst_175 = arith.constant 5.000000e-01 : f32
    %327 = vector.broadcast %cst_175 : f32 to vector<8x128xf32>
    %328 = arith.mulf %327, %326 : vector<8x128xf32>
    %329 = vector.extract_strided_slice %320 {offsets = [0, 128], sizes = [8, 128], strides = [1, 1]} : vector<8x512xf32> to vector<8x128xf32>
    %cst_176 = arith.constant 5.000000e-01 : f32
    %330 = vector.broadcast %cst_176 : f32 to vector<8x128xf32>
    %331 = arith.mulf %330, %329 : vector<8x128xf32>
    %332 = math.tanh %331 : vector<8x128xf32>
    %cst_177 = arith.constant 1.000000e+00 : f32
    %333 = vector.broadcast %cst_177 : f32 to vector<8x128xf32>
    %334 = arith.addf %332, %333 : vector<8x128xf32>
    %cst_178 = arith.constant 5.000000e-01 : f32
    %335 = vector.broadcast %cst_178 : f32 to vector<8x128xf32>
    %336 = arith.mulf %335, %334 : vector<8x128xf32>
    %337 = vector.extract_strided_slice %320 {offsets = [0, 256], sizes = [8, 128], strides = [1, 1]} : vector<8x512xf32> to vector<8x128xf32>
    %338 = math.tanh %337 : vector<8x128xf32>
    %339 = vector.extract_strided_slice %320 {offsets = [0, 384], sizes = [8, 128], strides = [1, 1]} : vector<8x512xf32> to vector<8x128xf32>
    %cst_179 = arith.constant 5.000000e-01 : f32
    %340 = vector.broadcast %cst_179 : f32 to vector<8x128xf32>
    %341 = arith.mulf %340, %339 : vector<8x128xf32>
    %342 = math.tanh %341 : vector<8x128xf32>
    %cst_180 = arith.constant 1.000000e+00 : f32
    %343 = vector.broadcast %cst_180 : f32 to vector<8x128xf32>
    %344 = arith.addf %342, %343 : vector<8x128xf32>
    %cst_181 = arith.constant 5.000000e-01 : f32
    %345 = vector.broadcast %cst_181 : f32 to vector<8x128xf32>
    %346 = arith.mulf %345, %344 : vector<8x128xf32>
    %c0_182 = arith.constant 0 : index
    %c0_183 = arith.constant 0 : index
    %347 = vector.load %arg10[%c0_182, %c0_183] : memref<8x128xf32, #tpu.memory_space<vmem>>, vector<8x128xf32>
    %348 = arith.mulf %336, %347 : vector<8x128xf32>
    %349 = arith.mulf %328, %338 : vector<8x128xf32>
    %350 = arith.addf %348, %349 : vector<8x128xf32>
    %351 = math.tanh %350 : vector<8x128xf32>
    %352 = arith.mulf %346, %351 : vector<8x128xf32>
    %c0_184 = arith.constant 0 : index
    %c0_185 = arith.constant 0 : index
    %353 = vector.load %arg9[%c0_184, %c0_185] : memref<8x128xf32, #tpu.memory_space<vmem>>, vector<8x128xf32>
    tpu.vector_store %arg9[%c0_184, %c0_185], %352 {strides = array<i32>} : memref<8x128xf32, #tpu.memory_space<vmem>>, vector<8x128xf32>,
    %c0_186 = arith.constant 0 : index
    %c0_187 = arith.constant 0 : index
    %354 = vector.load %arg10[%c0_186, %c0_187] : memref<8x128xf32, #tpu.memory_space<vmem>>, vector<8x128xf32>
    tpu.vector_store %arg10[%c0_186, %c0_187], %350 {strides = array<i32>} : memref<8x128xf32, #tpu.memory_space<vmem>>, vector<8x128xf32>,
    %c8_i32_188 = arith.constant 8 : i32
    %c0_189 = arith.constant 0 : index
    %c0_190 = arith.constant 0 : index
    %355 = vector.load %arg9[%c0_189, %c0_190] : memref<8x128xf32, #tpu.memory_space<vmem>>, vector<8x128xf32>
    %356 = arith.truncf %355 : vector<8x128xf32> to vector<8x128xbf16>
    %c0_191 = arith.constant 0 : index
    %c0_192 = arith.constant 0 : index
    %357 = vector.load %arg5[%c0_191, %c0_192] : memref<128x128xbf16, #tpu.memory_space<vmem>>, vector<128x128xbf16>
    %cst_193 = arith.constant dense<0.000000e+00> : vector<8x128xf32>
    %358 = tpu.matmul %356, %357, %cst_193 {dimension_numbers = #tpu.dot_dimension_numbers<[1], [0], [0], [1], [0, 0, 1, 1], [], []>} : vector<8x128xbf16>, vector<128x128xbf16>, vector<8x128xf32> -> vector<8x128xf32>
    %c0_194 = arith.constant 0 : index
    %c0_195 = arith.constant 0 : index
    %359 = vector.load %arg6[%c0_194, %c0_195] : memref<1x128xf32, #tpu.memory_space<vmem>>, vector<1x128xf32>
    %360 = vector.broadcast %359 : vector<1x128xf32> to vector<8x128xf32>
    %361 = arith.addf %358, %360 : vector<8x128xf32>
    %c0_196 = arith.constant 0 : index
    %c0_197 = arith.constant 0 : index
    %362 = vector.load %arg7[%c0_196, %c0_197] : memref<8x128xf32, #tpu.memory_space<vmem>>, vector<8x128xf32>
    tpu.vector_store %arg7[%c0_196, %c0_197], %361 {strides = array<i32>} : memref<8x128xf32, #tpu.memory_space<vmem>>, vector<8x128xf32>,
    return
  }
  func.func @transform_0(%arg0: i32) -> (i32, i32) {
    %c0_i32 = arith.constant 0 : i32
    %c0_i32_0 = arith.constant 0 : i32
    %c0_i32_1 = arith.constant 0 : i32
    return %c0_i32, %c0_i32_0 : i32, i32
  }
  func.func @transform_1(%arg0: i32) -> (i32, i32) {
    %c0_i32 = arith.constant 0 : i32
    %c0_i32_0 = arith.constant 0 : i32
    %c0_i32_1 = arith.constant 0 : i32
    return %c0_i32, %c0_i32_0 : i32, i32
  }
  func.func @transform_2(%arg0: i32) -> (i32, i32) {
    %c0_i32 = arith.constant 0 : i32
    %c0_i32_0 = arith.constant 0 : i32
    %c0_i32_1 = arith.constant 0 : i32
    return %c0_i32, %c0_i32_0 : i32, i32
  }
  func.func @transform_3(%arg0: i32) -> (i32, i32) {
    %c0_i32 = arith.constant 0 : i32
    %c0_i32_0 = arith.constant 0 : i32
    %c0_i32_1 = arith.constant 0 : i32
    return %c0_i32, %c0_i32_0 : i32, i32
  }
  func.func @transform_4(%arg0: i32) -> (i32, i32) {
    %c0_i32 = arith.constant 0 : i32
    %c0_i32_0 = arith.constant 0 : i32
    %c0_i32_1 = arith.constant 0 : i32
    return %c0_i32, %c0_i32_0 : i32, i32
  }
  func.func @transform_5(%arg0: i32) -> (i32, i32) {
    %c0_i32 = arith.constant 0 : i32
    %c0_i32_0 = arith.constant 0 : i32
    %c0_i32_1 = arith.constant 0 : i32
    return %c0_i32, %c0_i32_0 : i32, i32
  }
  func.func @transform_6(%arg0: i32) -> (i32, i32) {
    %c0_i32 = arith.constant 0 : i32
    %c0_i32_0 = arith.constant 0 : i32
    %c0_i32_1 = arith.constant 0 : i32
    return %c0_i32, %c0_i32_0 : i32, i32
  }
}

</mosaic_0001>

<bundles_post_ra>
// kernel: tpu_custom_call.1
= control target key start
LH: loop header
LB: loop body
LE: loop exit
PB: predicated region body
PF: predicated region fallthrough
CT: control target
= control target key end

     0   :  { %11 = vsyncpa [#allocation6], 0  ;;  %s5284_s0 = inlined_call_operand.hbm [shape: bf16[64,384], index: 0, kind: input, shape index: {}]   ;;  %s5285_s1 = inlined_call_operand.hbm [shape: bf16[384,512], index: 1, kind: input, shape index: {}]   ;;  %s5286_s2 = inlined_call_operand.hbm [shape: bf16[128,512], index: 2, kind: input, shape index: {}]   ;;  %s5287_s3 = inlined_call_operand.vmem [shape: f32[1,512], index: 3, kind: input, shape index: {}]   ;;  %s5288_s4 = inlined_call_operand.hbm [shape: bf16[128,128], index: 4, kind: input, shape index: {}]   ;;  %s5289_s5 = inlined_call_operand.vmem [shape: f32[1,128], index: 5, kind: input, shape index: {}]   ;;  %s5290_s6 = inlined_call_operand.hbm [shape: f32[8,128], index: 6, kind: output, shape index: {}]  }
   0x1   :  { %12 = vsyncpa [#allocation9], 0 }
   0x2   :  { %13 = vsyncpa [#allocation12], 0 }
   0x3   :  { %14 = vsyncpa [#allocation7], 0  ;;  %s4629_s21 = smov [#allocation8]   ;;  %s4511_s25 = scalar_lea.hbm %s5285_s1, 12288 }
   0x4   :  { %s32_s22 = sshll.u32 %s4629_s21, 4  ;;  %p4512_p0 = scmp.ne.s32.totalorder %s5285_s1, %s4511_s25  ;;  %s33_s22 = int_to_ptr.vmem [resolvable:$true] %s32_s22 }
   0x5   :  { %p4515_p1 = scmp.lt.u32.totalorder %s4511_s25, %s5285_s1 }
   0x7   :  { %p4517_p2 = pnand %p4515_p1, %p4512_p0 }
   0x9   :  { %4520 = shalt.err (!%p4517_p2)
}
   0xa   :  { %s4521_s30 = scalar_lea.vmem %s33_s22, 12288  ;;  %p4526_p4 = scmp.lt.s32.totalorder %s33_s22, %s33_s22 }
   0xb   :  { %p4522_p3 = scmp.ne.s32.totalorder %s33_s22, %s4521_s30  ;;  %p4527_p5 = scmp.lt.s32.totalorder %s4521_s30, %s4521_s30 }
   0xd   :  { %p4528_p6 = por %p4527_p5, %p4526_p4 }
   0xf   :  { %p4529_p7 = pnand %p4528_p6, %p4522_p3 }
  0x11   :  { %4532 = shalt.err (!%p4529_p7)
}
  0x12   :  { %s4630_s7 = smov 256   ;;  %s4631_s8 = smov 16  }
  0x13   :  { %38 = dma.hbm_to_vmem [thread:$0]  %s5285_s1, 12288, %s33_s22, [#allocation9], %s4630_s7, %s4630_s7, %s4631_s8  }
  0x14   :  { %s4632_s11 = smov [#allocation5]   ;;  %s4533_s15 = scalar_lea.hbm %s5284_s0, 1536 }
  0x15   :  { %s20_s12 = sshll.u32 %s4632_s11, 4  ;;  %p4534_p8 = scmp.ne.s32.totalorder %s5284_s0, %s4533_s15  ;;  %s21_s12 = int_to_ptr.vmem [resolvable:$true] %s20_s12 }
  0x16   :  { %p4537_p9 = scmp.lt.u32.totalorder %s4533_s15, %s5284_s0 }
  0x18   :  { %p4539_p10 = pnand %p4537_p9, %p4534_p8 }
  0x1a   :  { %4542 = shalt.err (!%p4539_p10)
}
  0x1b   :  { %s4543_s20 = scalar_lea.vmem %s21_s12, 1536  ;;  %p4548_p12 = scmp.lt.s32.totalorder %s21_s12, %s21_s12 }
  0x1c   :  { %p4544_p11 = scmp.ne.s32.totalorder %s21_s12, %s4543_s20  ;;  %p4549_p13 = scmp.lt.s32.totalorder %s4543_s20, %s4543_s20 }
  0x1e   :  { %p4550_p0 = por %p4549_p13, %p4548_p12 }
  0x20   :  { %p4551_p1 = pnand %p4550_p0, %p4544_p11 }
  0x22   :  { %4554 = shalt.err (!%p4551_p1)
}
  0x23   :  { %s4633_s1 = smov 192   ;;  %s4634_s21 = smov 12  }
  0x24   :  { %26 = dma.hbm_to_vmem [thread:$0]  %s5284_s0, 1536, %s21_s12, [#allocation6], %s4633_s1, %s4633_s1, %s4634_s21  }
  0x25   :  { %s4635_s24 = smov [#allocation10]   ;;  %s4636_s26 = smov [#allocation11]  }
  0x26   :  { %s44_s25 = sshll.u32 %s4635_s24, 4  ;;  %s58_s27 = sshll.u32 %s4636_s26, 4  ;;  %s45_s25 = int_to_ptr.vmem [resolvable:$true] %s44_s25  ;;  %s4706_s27 = int_to_ptr.vmem [resolvable:$true] %s58_s27 }
  0x27   :  { %s4555_s30 = scalar_lea.hbm %s5286_s2, 4096 }
  0x28   :  { %p4556_p2 = scmp.ne.s32.totalorder %s5286_s2, %s4555_s30  ;;  %p4559_p3 = scmp.lt.u32.totalorder %s4555_s30, %s5286_s2 }
  0x2a   :  { %p4561_p4 = pnand %p4559_p3, %p4556_p2 }
  0x2c   :  { %4564 = shalt.err (!%p4561_p4)
}
  0x2d   :  { %s4565_s0 = scalar_lea.vmem %s45_s25, 4096  ;;  %p4570_p6 = scmp.lt.s32.totalorder %s45_s25, %s45_s25 }
  0x2e   :  { %p4566_p5 = scmp.ne.s32.totalorder %s45_s25, %s4565_s0  ;;  %p4571_p7 = scmp.lt.s32.totalorder %s4565_s0, %s4565_s0 }
  0x30   :  { %p4572_p8 = por %p4571_p7, %p4570_p6 }
  0x32   :  { %p4573_p9 = pnand %p4572_p8, %p4566_p5 }
  0x34   :  { %4576 = shalt.err (!%p4573_p9)
}
  0x35   :  { %50 = dma.hbm_to_vmem [thread:$0]  %s5286_s2, 4096, %s45_s25, [#allocation9], %s4630_s7, %s4630_s7, %s4631_s8  }
  0x36   :  { %s4577_s17 = scalar_lea.hbm %s5288_s4, 1024 }
  0x37   :  { %p4578_p10 = scmp.ne.s32.totalorder %s5288_s4, %s4577_s17  ;;  %p4581_p11 = scmp.lt.u32.totalorder %s4577_s17, %s5288_s4 }
  0x39   :  { %p4583_p12 = pnand %p4581_p11, %p4578_p10 }
  0x3b   :  { %4586 = shalt.err (!%p4583_p12)
}
  0x3c   :  { %s4587_s21 = scalar_lea.vmem %s4706_s27, 1024  ;;  %p4592_p0 = scmp.lt.s32.totalorder %s4706_s27, %s4706_s27 }
  0x3d   :  { %p4588_p13 = scmp.ne.s32.totalorder %s4706_s27, %s4587_s21  ;;  %p4593_p1 = scmp.lt.s32.totalorder %s4587_s21, %s4587_s21 }
  0x3f   :  { %p4594_p2 = por %p4593_p1, %p4592_p0 }
  0x41   :  { %p4595_p3 = pnand %p4594_p2, %p4588_p13 }
  0x43   :  { %4598 = shalt.err (!%p4595_p3)
}
  0x44   :  { %s4637_s2 = smov 64   ;;  %s4638_s7 = smov 4  }
  0x45   :  { %64 = dma.hbm_to_vmem [thread:$0]  %s5288_s4, 1024, %s4706_s27, [#allocation12], %s4637_s2, %s4637_s2, %s4638_s7  }
  0x46   :  { %4621 = dma.done.wait [#allocation6], 1536  }
  0x47   :  { %4622 = vsyncadd [#allocation6], 4294965760 }
  0x48   :  { %4623 = dma.done.wait [#allocation9], 16384  }
  0x49   :  { %4624 = vsyncadd [#allocation9], 4294950912 }
  0x4a   :  { %4625 = dma.done.wait [#allocation12], 1024  }
  0x4b   :  { %4626 = vsyncadd [#allocation12], 4294966272  ;;  %v4167_v0 = vld [vmem:[#allocation8 + $0x4] ss:$16 sps:$4 sm:$0xff]   ;;  %v4169_v1 = vld [vmem:[#allocation8 + $0xc] ss:$16 sps:$4 sm:$0xff]  }
  0x4c   :  { %758 = vmatprep.subr.bf16.mxu0 %v4167_v0  ;;  %v4171_v2 = vld [vmem:[#allocation8] ss:$16 sps:$4 sm:$0xff]   ;;  %v4172_v3 = vld [vmem:[#allocation8 + $0x8] ss:$16 sps:$4 sm:$0xff]   ;;  %904 = vmatprep.subr.bf16.mxu1 %v4169_v1  ;;  %v4173_v4 = vld [vmem:[#allocation8 + $0x24] ss:$16 sps:$4 sm:$0xff]  }
  0x4d   :  { %759 = vmatpush1.bf16.msra.mxu0 %v4171_v2  ;;  %905 = vmatpush1.bf16.msra.mxu1 %v4172_v3  ;;  %v4175_v5 = vld [vmem:[#allocation8 + $0x2c] ss:$16 sps:$4 sm:$0xff]   ;;  %v4177_v6 = vld [vmem:[#allocation8 + $0x20] ss:$16 sps:$4 sm:$0xff]   ;;  %v4178_v7 = vld [vmem:[#allocation8 + $0x28] ss:$16 sps:$4 sm:$0xff]  }
  0x4e   :  { %760 = vmatprep.subr.bf16.mxu0 %v4173_v4  ;;  %906 = vmatprep.subr.bf16.mxu1 %v4175_v5  ;;  %v4179_v8 = vld [vmem:[#allocation8 + $0x44] ss:$16 sps:$4 sm:$0xff]   ;;  %v4181_v9 = vld [vmem:[#allocation8 + $0x4c] ss:$16 sps:$4 sm:$0xff]   ;;  %v4183_v10 = vld [vmem:[#allocation8 + $0x40] ss:$16 sps:$4 sm:$0xff]  }
  0x4f   :  { %v4184_v11 = vld [vmem:[#allocation8 + $0x48] ss:$16 sps:$4 sm:$0xff]   ;;  %v4185_v12 = vld [vmem:[#allocation8 + $0x64] ss:$16 sps:$4 sm:$0xff]   ;;  %v4187_v13 = vld [vmem:[#allocation8 + $0x6c] ss:$16 sps:$4 sm:$0xff]  }
  0x50   :  { %v4189_v14 = vld [vmem:[#allocation8 + $0x60] ss:$16 sps:$4 sm:$0xff]   ;;  %v4190_v15 = vld [vmem:[#allocation8 + $0x68] ss:$16 sps:$4 sm:$0xff]   ;;  %v4191_v16 = vld [vmem:[#allocation8 + $0x84] ss:$16 sps:$4 sm:$0xff]  }
  0x51   :  { %761 = vmatpush1.bf16.msra.mxu0 %v4177_v6  ;;  %907 = vmatpush1.bf16.msra.mxu1 %v4178_v7  ;;  %v4193_v17 = vld [vmem:[#allocation8 + $0x8c] ss:$16 sps:$4 sm:$0xff]   ;;  %v4195_v18 = vld [vmem:[#allocation8 + $0x80] ss:$16 sps:$4 sm:$0xff]   ;;  %v4196_v19 = vld [vmem:[#allocation8 + $0x88] ss:$16 sps:$4 sm:$0xff]  }
  0x52   :  { %762 = vmatprep.subr.bf16.mxu0 %v4179_v8  ;;  %908 = vmatprep.subr.bf16.mxu1 %v4181_v9  ;;  %v4197_v20 = vld [vmem:[#allocation8 + $0xa4] ss:$16 sps:$4 sm:$0xff]   ;;  %v4199_v21 = vld [vmem:[#allocation8 + $0xac] ss:$16 sps:$4 sm:$0xff]   ;;  %v4201_v22 = vld [vmem:[#allocation8 + $0xa0] ss:$16 sps:$4 sm:$0xff]  }
  0x53   :  { %v4202_v23 = vld [vmem:[#allocation8 + $0xa8] ss:$16 sps:$4 sm:$0xff]   ;;  %v4203_v24 = vld [vmem:[#allocation8 + $0xc4] ss:$16 sps:$4 sm:$0xff]   ;;  %v4205_v25 = vld [vmem:[#allocation8 + $0xcc] ss:$16 sps:$4 sm:$0xff]  }
  0x54   :  { %v4207_v26 = vld [vmem:[#allocation8 + $0xc0] ss:$16 sps:$4 sm:$0xff]   ;;  %v4208_v27 = vld [vmem:[#allocation8 + $0xc8] ss:$16 sps:$4 sm:$0xff]   ;;  %v4209_v28 = vld [vmem:[#allocation8 + $0xe4] ss:$16 sps:$4 sm:$0xff]  }
  0x55   :  { %763 = vmatpush1.bf16.msra.mxu0 %v4183_v10  ;;  %909 = vmatpush1.bf16.msra.mxu1 %v4184_v11  ;;  %v4211_v29 = vld [vmem:[#allocation8 + $0xec] ss:$16 sps:$4 sm:$0xff]   ;;  %v4213_v30 = vld [vmem:[#allocation8 + $0xe0] ss:$16 sps:$4 sm:$0xff]   ;;  %v4214_v31 = vld [vmem:[#allocation8 + $0xe8] ss:$16 sps:$4 sm:$0xff]  }
  0x56   :  { %764 = vmatprep.subr.bf16.mxu0 %v4185_v12  ;;  %910 = vmatprep.subr.bf16.mxu1 %v4187_v13  ;;  %v4215_v32 = vld [vmem:[#allocation8 + $0x104] ss:$16 sps:$4 sm:$0xff]   ;;  %v4217_v33 = vld [vmem:[#allocation8 + $0x10c] ss:$16 sps:$4 sm:$0xff]   ;;  %v4219_v34 = vld [vmem:[#allocation8 + $0x100] ss:$16 sps:$4 sm:$0xff]  }
  0x57   :  { %v4220_v35 = vld [vmem:[#allocation8 + $0x108] ss:$16 sps:$4 sm:$0xff]   ;;  %v4221_v36 = vld [vmem:[#allocation8 + $0x124] ss:$16 sps:$4 sm:$0xff]   ;;  %v4223_v37 = vld [vmem:[#allocation8 + $0x12c] ss:$16 sps:$4 sm:$0xff]  }
  0x58   :  { %v4225_v38 = vld [vmem:[#allocation8 + $0x120] ss:$16 sps:$4 sm:$0xff]   ;;  %v4226_v39 = vld [vmem:[#allocation8 + $0x128] ss:$16 sps:$4 sm:$0xff]   ;;  %v4227_v40 = vld [vmem:[#allocation8 + $0x144] ss:$16 sps:$4 sm:$0xff]  }
  0x59   :  { %765 = vmatpush1.bf16.msra.mxu0 %v4189_v14  ;;  %911 = vmatpush1.bf16.msra.mxu1 %v4190_v15  ;;  %v4229_v41 = vld [vmem:[#allocation8 + $0x14c] ss:$16 sps:$4 sm:$0xff]   ;;  %v4231_v42 = vld [vmem:[#allocation8 + $0x140] ss:$16 sps:$4 sm:$0xff]   ;;  %v4232_v43 = vld [vmem:[#allocation8 + $0x148] ss:$16 sps:$4 sm:$0xff]  }
  0x5a   :  { %766 = vmatprep.subr.bf16.mxu0 %v4191_v16  ;;  %912 = vmatprep.subr.bf16.mxu1 %v4193_v17  ;;  %v4233_v44 = vld [vmem:[#allocation8 + $0x164] ss:$16 sps:$4 sm:$0xff]   ;;  %v4235_v45 = vld [vmem:[#allocation8 + $0x16c] ss:$16 sps:$4 sm:$0xff]   ;;  %v4237_v46 = vld [vmem:[#allocation8 + $0x160] ss:$16 sps:$4 sm:$0xff]  }
  0x5b   :  { %v4238_v47 = vld [vmem:[#allocation8 + $0x168] ss:$16 sps:$4 sm:$0xff]   ;;  %v4265_v48 = vld [vmem:[#allocation5 + $0x4] ss:$12 sps:$4 sm:$0xff]   ;;  %v4241_v50 = vld [vmem:[#allocation8 + $0x18c] ss:$16 sps:$4 sm:$0xff]  }
  0x5c   :  { %v4239_v49 = vld [vmem:[#allocation8 + $0x184] ss:$16 sps:$4 sm:$0xff]   ;;  %790 = vmatprep.mubr.bf16.mxu0 %v4265_v48  ;;  %936 = vmatprep.mubr.bf16.mxu1 %v4265_v48  ;;  %v4243_v51 = vld [vmem:[#allocation8 + $0x180] ss:$16 sps:$4 sm:$0xff]   ;;  %v4244_v52 = vld [vmem:[#allocation8 + $0x188] ss:$16 sps:$4 sm:$0xff]  }
  0x5d   :  { %767 = vmatpush1.bf16.msra.mxu0 %v4195_v18  ;;  %913 = vmatpush1.bf16.msra.mxu1 %v4196_v19  ;;  %v4245_v53 = vld [vmem:[#allocation8 + $0x1a4] ss:$16 sps:$4 sm:$0xff]   ;;  %v4247_v54 = vld [vmem:[#allocation8 + $0x1ac] ss:$16 sps:$4 sm:$0xff]   ;;  %v4249_v55 = vld [vmem:[#allocation8 + $0x1a0] ss:$16 sps:$4 sm:$0xff]  }
  0x5e   :  { %768 = vmatprep.subr.bf16.mxu0 %v4197_v20  ;;  %914 = vmatprep.subr.bf16.mxu1 %v4199_v21  ;;  %v4250_v56 = vld [vmem:[#allocation8 + $0x1a8] ss:$16 sps:$4 sm:$0xff]   ;;  %v4251_v57 = vld [vmem:[#allocation8 + $0x1c4] ss:$16 sps:$4 sm:$0xff]   ;;  %v4253_v58 = vld [vmem:[#allocation8 + $0x1cc] ss:$16 sps:$4 sm:$0xff]  }
  0x5f   :  { %v4255_v59 = vld [vmem:[#allocation8 + $0x1c0] ss:$16 sps:$4 sm:$0xff]   ;;  %v4256_v60 = vld [vmem:[#allocation8 + $0x1c8] ss:$16 sps:$4 sm:$0xff]   ;;  %v4257_v61 = vld [vmem:[#allocation8 + $0x1e4] ss:$16 sps:$4 sm:$0xff]  }
  0x60   :  { %v4259_v62 = vld [vmem:[#allocation8 + $0x1ec] ss:$16 sps:$4 sm:$0xff]   ;;  %v4261_v63 = vld [vmem:[#allocation8 + $0x1e0] ss:$16 sps:$4 sm:$0xff]   ;;  %v4262_v0 = vld [vmem:[#allocation8 + $0x1e8] ss:$16 sps:$4 sm:$0xff]  }
  0x61   :  { %769 = vmatpush1.bf16.msra.mxu0 %v4201_v22  ;;  %915 = vmatpush1.bf16.msra.mxu1 %v4202_v23  ;;  %v4268_v1 = vld [vmem:[#allocation8 + $0x204] ss:$16 sps:$4 sm:$0xff]   ;;  %v4271_v2 = vld [vmem:[#allocation8 + $0x20c] ss:$16 sps:$4 sm:$0xff]   ;;  %v4266_v4 = vld [vmem:[#allocation8 + $0x200] ss:$16 sps:$4 sm:$0xff]  }
  0x62   :  { %770 = vmatprep.subr.bf16.mxu0 %v4203_v24  ;;  %916 = vmatprep.subr.bf16.mxu1 %v4205_v25  ;;  %v4263_v3 = vld [vmem:[#allocation5] ss:$12 sps:$4 sm:$0xff]   ;;  %v4269_v5 = vld [vmem:[#allocation8 + $0x208] ss:$16 sps:$4 sm:$0xff]   ;;  %v4274_v6 = vld [vmem:[#allocation8 + $0x224] ss:$16 sps:$4 sm:$0xff]  }
  0x63   :  { %v4277_v7 = vld [vmem:[#allocation8 + $0x22c] ss:$16 sps:$4 sm:$0xff]   ;;  %v4272_v9 = vld [vmem:[#allocation8 + $0x220] ss:$16 sps:$4 sm:$0xff]   ;;  %v4275_v10 = vld [vmem:[#allocation8 + $0x228] ss:$16 sps:$4 sm:$0xff]  }
  0x64   :  { %v4278_v8 = vld [vmem:[#allocation5 + $0x1c] ss:$12 sps:$4 sm:$0xff]   ;;  %v4283_v11 = vld [vmem:[#allocation8 + $0x244] ss:$16 sps:$4 sm:$0xff]   ;;  %v4281_v14 = vld [vmem:[#allocation8 + $0x240] ss:$16 sps:$4 sm:$0xff]  }
  0x65   :  { %771 = vmatpush1.bf16.msra.mxu0 %v4207_v26  ;;  %917 = vmatpush1.bf16.msra.mxu1 %v4208_v27  ;;  %v4286_v12 = vld [vmem:[#allocation8 + $0x24c] ss:$16 sps:$4 sm:$0xff]   ;;  %v4280_v13 = vld [vmem:[#allocation5 + $0x18] ss:$12 sps:$4 sm:$0xff]   ;;  %v4293_v18 = vld [vmem:[#allocation5 + $0x34] ss:$12 sps:$4 sm:$0xff]  }
  0x66   :  { %772 = vmatprep.subr.bf16.mxu0 %v4209_v28  ;;  %918 = vmatprep.subr.bf16.mxu1 %v4211_v29  ;;  %v4284_v15 = vld [vmem:[#allocation8 + $0x248] ss:$16 sps:$4 sm:$0xff]   ;;  %v4289_v16 = vld [vmem:[#allocation8 + $0x264] ss:$16 sps:$4 sm:$0xff]   ;;  %v4292_v17 = vld [vmem:[#allocation8 + $0x26c] ss:$16 sps:$4 sm:$0xff]  }
  0x67   :  { %v4287_v19 = vld [vmem:[#allocation8 + $0x260] ss:$16 sps:$4 sm:$0xff]   ;;  %v4290_v20 = vld [vmem:[#allocation8 + $0x268] ss:$16 sps:$4 sm:$0xff]   ;;  %v4298_v21 = vld [vmem:[#allocation8 + $0x284] ss:$16 sps:$4 sm:$0xff]  }
  0x68   :  { %v4301_v22 = vld [vmem:[#allocation8 + $0x28c] ss:$16 sps:$4 sm:$0xff]   ;;  %v4296_v24 = vld [vmem:[#allocation8 + $0x280] ss:$16 sps:$4 sm:$0xff]   ;;  %v4299_v25 = vld [vmem:[#allocation8 + $0x288] ss:$16 sps:$4 sm:$0xff]  }
  0x69   :  { %773 = vmatpush1.bf16.msra.mxu0 %v4213_v30  ;;  %919 = vmatpush1.bf16.msra.mxu1 %v4214_v31  ;;  %v4295_v23 = vld [vmem:[#allocation5 + $0x30] ss:$12 sps:$4 sm:$0xff]   ;;  %v4304_v26 = vld [vmem:[#allocation8 + $0x2a4] ss:$16 sps:$4 sm:$0xff]   ;;  %v4308_v28 = vld [vmem:[#allocation5 + $0x4c] ss:$12 sps:$4 sm:$0xff]  }
  0x6a   :  { %774 = vmatprep.subr.bf16.mxu0 %v4215_v32  ;;  %920 = vmatprep.subr.bf16.mxu1 %v4217_v33  ;;  %v4307_v27 = vld [vmem:[#allocation8 + $0x2ac] ss:$16 sps:$4 sm:$0xff]   ;;  %v4302_v29 = vld [vmem:[#allocation8 + $0x2a0] ss:$16 sps:$4 sm:$0xff]   ;;  %v4305_v30 = vld [vmem:[#allocation8 + $0x2a8] ss:$16 sps:$4 sm:$0xff]  }
  0x6b   :  { %v4313_v31 = vld [vmem:[#allocation8 + $0x2c4] ss:$16 sps:$4 sm:$0xff]   ;;  %v4316_v32 = vld [vmem:[#allocation8 + $0x2cc] ss:$16 sps:$4 sm:$0xff]   ;;  %v4756_v48 = vld [vmem:[#allocation10 + $0x20] ss:$16 sps:$4 sm:$0xff]  }
  0x6c   :  { %v4310_v33 = vld [vmem:[#allocation5 + $0x48] ss:$12 sps:$4 sm:$0xff]   ;;  %vm4642_vm0 = vmmov 0   ;;  %s4643_s25 = smov [#allocation13]  }
  0x6d   :  { %775 = vmatpush1.bf16.msra.mxu0 %v4219_v34  ;;  %921 = vmatpush1.bf16.msra.mxu1 %v4220_v35  ;;  %v4311_v34 = vld [vmem:[#allocation8 + $0x2c0] ss:$16 sps:$4 sm:$0xff]   ;;  %v4314_v35 = vld [vmem:[#allocation8 + $0x2c8] ss:$16 sps:$4 sm:$0xff]   ;;  %s3668_s26 = sshll.u32 %s4643_s25, 4  ;;  %s3669_s26 = int_to_ptr.vmem [resolvable:$true] %s3668_s26 }
  0x6e   :  { %776 = vmatprep.subr.bf16.mxu0 %v4221_v36  ;;  %922 = vmatprep.subr.bf16.mxu1 %v4223_v37  ;;  %v4319_v36 = vld [vmem:[#allocation8 + $0x2e4] ss:$16 sps:$4 sm:$0xff]   ;;  %v4322_v37 = vld [vmem:[#allocation8 + $0x2ec] ss:$16 sps:$4 sm:$0xff]   ;;  %s4599_s27 = scalar_lea.vmem %s3669_s26, 128  ;;  %p4604_p5 = scmp.lt.s32.totalorder %s3669_s26, %s3669_s26 }
  0x6f   :  { %p4600_p4 = scmp.ne.s32.totalorder %s3669_s26, %s4599_s27  ;;  %p4605_p6 = scmp.lt.s32.totalorder %s4599_s27, %s4599_s27 }
  0x71   :  { %777 = vmatpush1.bf16.msra.mxu0 %v4225_v38  ;;  %923 = vmatpush1.bf16.msra.mxu1 %v4226_v39  ;;  %v4317_v38 = vld [vmem:[#allocation8 + $0x2e0] ss:$16 sps:$4 sm:$0xff]   ;;  %v4320_v39 = vld [vmem:[#allocation8 + $0x2e8] ss:$16 sps:$4 sm:$0xff]   ;;  %p4606_p7 = por %p4605_p6, %p4604_p5 }
  0x72   :  { %778 = vmatprep.subr.bf16.mxu0 %v4227_v40  ;;  %924 = vmatprep.subr.bf16.mxu1 %v4229_v41  ;;  %v4740_v40 = vld [vmem:[#allocation10 + $0x4] ss:$16 sps:$4 sm:$0xff]   ;;  %v4742_v41 = vld [vmem:[#allocation10 + $0xc] ss:$16 sps:$4 sm:$0xff]  }
  0x73   :  { %p4607_p8 = pnand %p4606_p7, %p4600_p4 }
  0x75   :  { %779 = vmatpush1.bf16.msra.mxu0 %v4231_v42  ;;  %925 = vmatpush1.bf16.msra.mxu1 %v4232_v43  ;;  %v5291_v42 = vmov 0   ;;  %v4323_v43 = vld [vmem:[#allocation5 + $0x8] ss:$12 sps:$4 sm:$0xff]  }
  0x76   :  { %780 = vmatprep.subr.bf16.mxu0 %v4233_v44  ;;  %926 = vmatprep.subr.bf16.mxu1 %v4235_v45  ;;  %v4746_v44 = vld [vmem:[#allocation10] ss:$16 sps:$4 sm:$0xff]   ;;  %v4748_v45 = vld [vmem:[#allocation10 + $0x8] ss:$16 sps:$4 sm:$0xff]  }
  0x79   :  { %781 = vmatpush1.bf16.msra.mxu0 %v4237_v46  ;;  %927 = vmatpush1.bf16.msra.mxu1 %v4238_v47  ;;  %v4750_v46 = vld [vmem:[#allocation10 + $0x24] ss:$16 sps:$4 sm:$0xff]   ;;  %v4752_v47 = vld [vmem:[#allocation10 + $0x2c] ss:$16 sps:$4 sm:$0xff]  }
  0x7a   :  { %782 = vmatprep.subr.bf16.mxu0 %v4239_v49  ;;  %928 = vmatprep.subr.bf16.mxu1 %v4241_v50  ;;  %v4758_v49 = vld [vmem:[#allocation10 + $0x28] ss:$16 sps:$4 sm:$0xff]   ;;  %v4760_v50 = vld [vmem:[#allocation10 + $0x44] ss:$16 sps:$4 sm:$0xff]  }
  0x7d   :  { %783 = vmatpush1.bf16.msra.mxu0 %v4243_v51  ;;  %929 = vmatpush1.bf16.msra.mxu1 %v4244_v52  ;;  %v4762_v51 = vld [vmem:[#allocation10 + $0x4c] ss:$16 sps:$4 sm:$0xff]  }
  0x7e   :  { %784 = vmatprep.subr.bf16.mxu0 %v4245_v53  ;;  %930 = vmatprep.subr.bf16.mxu1 %v4247_v54  ;;  %v4336_v52 = vld [vmem:[#allocation5 + $0x20] ss:$12 sps:$4 sm:$0xff]   ;;  %v4772_v54 = vld [vmem:[#allocation10 + $0x48] ss:$16 sps:$4 sm:$0xff]  }
  0x7f   :  { %v4770_v53 = vld [vmem:[#allocation10 + $0x40] ss:$16 sps:$4 sm:$0xff]  }
  0x81   :  { %785 = vmatpush1.bf16.msra.mxu0 %v4249_v55  ;;  %931 = vmatpush1.bf16.msra.mxu1 %v4250_v56  ;;  %v4774_v55 = vld [vmem:[#allocation10 + $0x64] ss:$16 sps:$4 sm:$0xff]   ;;  %v4776_v56 = vld [vmem:[#allocation10 + $0x6c] ss:$16 sps:$4 sm:$0xff]  }
  0x82   :  { %786 = vmatprep.subr.bf16.mxu0 %v4251_v57  ;;  %932 = vmatprep.subr.bf16.mxu1 %v4253_v58  ;;  %v4782_v57 = vld [vmem:[#allocation10 + $0x60] ss:$16 sps:$4 sm:$0xff]   ;;  %v4784_v58 = vld [vmem:[#allocation10 + $0x68] ss:$16 sps:$4 sm:$0xff]  }
  0x85   :  { %787 = vmatpush1.bf16.msra.mxu0 %v4255_v59  ;;  %933 = vmatpush1.bf16.msra.mxu1 %v4256_v60  ;;  %v4786_v59 = vld [vmem:[#allocation10 + $0x84] ss:$16 sps:$4 sm:$0xff]   ;;  %v4788_v60 = vld [vmem:[#allocation10 + $0x8c] ss:$16 sps:$4 sm:$0xff]  }
  0x86   :  { %788 = vmatprep.subr.bf16.mxu0 %v4257_v61  ;;  %934 = vmatprep.subr.bf16.mxu1 %v4259_v62  ;;  %v4349_v61 = vld [vmem:[#allocation5 + $0x38] ss:$12 sps:$4 sm:$0xff]   ;;  %v4798_v62 = vld [vmem:[#allocation10 + $0x80] ss:$16 sps:$4 sm:$0xff]  }
  0x89   :  { %789 = vmatpush1.bf16.msra.mxu0 %v4261_v63  ;;  %935 = vmatpush1.bf16.msra.mxu1 %v4262_v0  ;;  %v4800_v63 = vld [vmem:[#allocation10 + $0x88] ss:$16 sps:$4 sm:$0xff]   ;;  %v4804_v0 = vld [vmem:[#allocation10 + $0xa4] ss:$16 sps:$4 sm:$0xff]  }
  0x8a   :  { %831 = vmatprep.subr.bf16.mxu0 %v4268_v1  ;;  %977 = vmatprep.subr.bf16.mxu1 %v4271_v2  ;;  %v4806_v1 = vld [vmem:[#allocation10 + $0xac] ss:$16 sps:$4 sm:$0xff]   ;;  %v4810_v2 = vld [vmem:[#allocation10 + $0xa0] ss:$16 sps:$4 sm:$0xff]  }
  0x8c   :  { %791 = vmatmul.mubr.bf16.vlgmr.msra.gmra.mrb[0].mxu0 %v4263_v3  ;;  %937 = vmatmul.mubr.bf16.vlgmr.msra.gmra.mrb[0].mxu1 %v4263_v3  ;;  %v4812_v3 = vld [vmem:[#allocation10 + $0xa8] ss:$16 sps:$4 sm:$0xff]  }
  0x8d   :  { %832 = vmatpush1.bf16.msra.mxu0 %v4266_v4  ;;  %978 = vmatpush1.bf16.msra.mxu1 %v4269_v5  ;;  %v4816_v4 = vld [vmem:[#allocation10 + $0xc4] ss:$16 sps:$4 sm:$0xff]   ;;  %v4818_v5 = vld [vmem:[#allocation10 + $0xcc] ss:$16 sps:$4 sm:$0xff]  }
  0x8e   :  { %833 = vmatprep.subr.bf16.mxu0 %v4274_v6  ;;  %979 = vmatprep.subr.bf16.mxu1 %v4277_v7  ;;  %v4362_v6 = vld [vmem:[#allocation5 + $0x50] ss:$12 sps:$4 sm:$0xff]  }
  0x8f   :  { %800 = vmatprep.mubr.bf16.mxu0 %v4278_v8  ;;  %946 = vmatprep.mubr.bf16.mxu1 %v4278_v8  ;;  %v4824_v7 = vld [vmem:[#allocation10 + $0xc0] ss:$16 sps:$4 sm:$0xff]   ;;  %v4826_v8 = vld [vmem:[#allocation10 + $0xc8] ss:$16 sps:$4 sm:$0xff]  }
  0x91   :  { %834 = vmatpush1.bf16.msra.mxu0 %v4272_v9  ;;  %980 = vmatpush1.bf16.msra.mxu1 %v4275_v10  ;;  %v4830_v9 = vld [vmem:[#allocation10 + $0xe4] ss:$16 sps:$4 sm:$0xff]   ;;  %v4832_v10 = vld [vmem:[#allocation10 + $0xec] ss:$16 sps:$4 sm:$0xff]  }
  0x92   :  { %835 = vmatprep.subr.bf16.mxu0 %v4283_v11  ;;  %981 = vmatprep.subr.bf16.mxu1 %v4286_v12  ;;  %v4836_v11 = vld [vmem:[#allocation10 + $0xe0] ss:$16 sps:$4 sm:$0xff]   ;;  %v4838_v12 = vld [vmem:[#allocation10 + $0xe8] ss:$16 sps:$4 sm:$0xff]  }
  0x94   :  { %801 = vmatmul.mubr.bf16.gmra.mrb[4].mxu0 %v4280_v13  ;;  %947 = vmatmul.mubr.bf16.gmra.mrb[4].mxu1 %v4280_v13  ;;  %v4640_v13 = vmov 0.0|0.0  }
  0x95   :  { %836 = vmatpush1.bf16.msra.mxu0 %v4281_v14  ;;  %982 = vmatpush1.bf16.msra.mxu1 %v4284_v15  ;;  %v194_v14 = vlaneseq }
  0x96   :  { %837 = vmatprep.subr.bf16.mxu0 %v4289_v16  ;;  %983 = vmatprep.subr.bf16.mxu1 %v4292_v17 }
  0x97   :  { %810 = vmatprep.mubr.bf16.mxu0 %v4293_v18  ;;  %956 = vmatprep.mubr.bf16.mxu1 %v4293_v18  ;;  %v195_v15 = vshrl.u32 %v194_v14, 7  ;;  %v192_v18 = vld [vmem:[%s5287_s3] sm:$0xf] }
  0x99   :  { %838 = vmatpush1.bf16.msra.mxu0 %v4287_v19  ;;  %984 = vmatpush1.bf16.msra.mxu1 %v4290_v20  ;;  %v196_v16 = vsub.s32 0, %v195_v15  ;;  %v204_v17 = vsub.s32 2, %v195_v15  ;;  %v200_v19 = vsub.s32 1, %v195_v15  ;;  %v208_v20 = vsub.s32 3, %v195_v15 }
  0x9a   :  { %839 = vmatprep.subr.bf16.mxu0 %v4298_v21  ;;  %985 = vmatprep.subr.bf16.mxu1 %v4301_v22 }
  0x9c   :  { %811 = vmatmul.mubr.bf16.gmra.mrb[8].mxu0 %v4295_v23  ;;  %957 = vmatmul.mubr.bf16.gmra.mrb[8].mxu1 %v4295_v23  ;;  %v197_v23 = vrot.slane %v192_v18, %v196_v16 }
  0x9d   :  { %840 = vmatpush1.bf16.msra.mxu0 %v4296_v24  ;;  %986 = vmatpush1.bf16.msra.mxu1 %v4299_v25  ;;  %v205_v24 = vrot.slane %v192_v18, %v204_v17 }
  0x9e   :  { %841 = vmatprep.subr.bf16.mxu0 %v4304_v26  ;;  %987 = vmatprep.subr.bf16.mxu1 %v4307_v27  ;;  %v201_v27 = vrot.slane %v192_v18, %v200_v19 }
  0x9f   :  { %820 = vmatprep.mubr.bf16.mxu0 %v4308_v28  ;;  %966 = vmatprep.mubr.bf16.mxu1 %v4308_v28  ;;  %v209_v28 = vrot.slane %v192_v18, %v208_v20 }
  0xa1   :  { %842 = vmatpush1.bf16.msra.mxu0 %v4302_v29  ;;  %988 = vmatpush1.bf16.msra.mxu1 %v4305_v30 }
  0xa2   :  { %843 = vmatprep.subr.bf16.mxu0 %v4313_v31  ;;  %989 = vmatprep.subr.bf16.mxu1 %v4316_v32 }
  0xa4   :  { %821 = vmatmul.mubr.bf16.gmra.mrb[12].mxu0 %v4310_v33  ;;  %967 = vmatmul.mubr.bf16.gmra.mrb[12].mxu1 %v4310_v33 }
  0xa5   :  { %844 = vmatpush1.bf16.msra.mxu0 %v4311_v34  ;;  %990 = vmatpush1.bf16.msra.mxu1 %v4314_v35 }
  0xa6   :  { %845 = vmatprep.subr.bf16.mxu0 %v4319_v36  ;;  %991 = vmatprep.subr.bf16.mxu1 %v4322_v37 }
  0xa7   :  { %863 = vmatprep.mubr.bf16.mxu0 %v5291_v42  ;;  %1009 = vmatprep.mubr.bf16.mxu1 %v5291_v42 }
  0xa9   :  { %846 = vmatpush1.bf16.msra.mxu0 %v4317_v38  ;;  %992 = vmatpush1.bf16.msra.mxu1 %v4320_v39 }
  0xaa   :  { %1285 = vmatprep.subr.bf16.mxu0 %v4740_v40  ;;  %1326 = vmatprep.subr.bf16.mxu1 %v4742_v41 }
  0xac   :  { %864 = vmatmul.mubr.bf16.vlgmr.msra.gmra.mrb[0].mxu0 %v4323_v43  ;;  %1010 = vmatmul.mubr.bf16.vlgmr.msra.gmra.mrb[0].mxu1 %v4323_v43 }
  0xad   :  { %1286 = vmatpush1.bf16.msra.mxu0 %v4746_v44  ;;  %1327 = vmatpush1.bf16.msra.mxu1 %v4748_v45 }
  0xae   :  { %1287 = vmatprep.subr.bf16.mxu0 %v4750_v46  ;;  %1328 = vmatprep.subr.bf16.mxu1 %v4752_v47 }
  0xaf   :  { %873 = vmatprep.mubr.bf16.mxu0 %v5291_v42  ;;  %1019 = vmatprep.mubr.bf16.mxu1 %v5291_v42 }
  0xb1   :  { %1288 = vmatpush1.bf16.msra.mxu0 %v4756_v48  ;;  %1329 = vmatpush1.bf16.msra.mxu1 %v4758_v49 }
  0xb2   :  { %1289 = vmatprep.subr.bf16.mxu0 %v4760_v50  ;;  %1330 = vmatprep.subr.bf16.mxu1 %v4762_v51 }
  0xb4   :  { %874 = vmatmul.mubr.bf16.gmra.mrb[4].mxu0 %v4336_v52  ;;  %1020 = vmatmul.mubr.bf16.gmra.mrb[4].mxu1 %v4336_v52 }
  0xb5   :  { %1290 = vmatpush1.bf16.msra.mxu0 %v4770_v53  ;;  %1331 = vmatpush1.bf16.msra.mxu1 %v4772_v54 }
  0xb6   :  { %1291 = vmatprep.subr.bf16.mxu0 %v4774_v55  ;;  %1332 = vmatprep.subr.bf16.mxu1 %v4776_v56 }
  0xb7   :  { %883 = vmatprep.mubr.bf16.mxu0 %v5291_v42  ;;  %1029 = vmatprep.mubr.bf16.mxu1 %v5291_v42 }
  0xb9   :  { %1292 = vmatpush1.bf16.msra.mxu0 %v4782_v57  ;;  %1333 = vmatpush1.bf16.msra.mxu1 %v4784_v58 }
  0xba   :  { %1293 = vmatprep.subr.bf16.mxu0 %v4786_v59  ;;  %1334 = vmatprep.subr.bf16.mxu1 %v4788_v60 }
  0xbc   :  { %884 = vmatmul.mubr.bf16.gmra.mrb[8].mxu0 %v4349_v61  ;;  %1030 = vmatmul.mubr.bf16.gmra.mrb[8].mxu1 %v4349_v61 }
  0xbd   :  { %1294 = vmatpush1.bf16.msra.mxu0 %v4798_v62  ;;  %1335 = vmatpush1.bf16.msra.mxu1 %v4800_v63 }
  0xbe   :  { %1295 = vmatprep.subr.bf16.mxu0 %v4804_v0  ;;  %1336 = vmatprep.subr.bf16.mxu1 %v4806_v1 }
  0xbf   :  { %893 = vmatprep.mubr.bf16.mxu0 %v5291_v42  ;;  %1039 = vmatprep.mubr.bf16.mxu1 %v5291_v42 }
  0xc1   :  { %1296 = vmatpush1.bf16.msra.mxu0 %v4810_v2  ;;  %1337 = vmatpush1.bf16.msra.mxu1 %v4812_v3 }
  0xc2   :  { %1297 = vmatprep.subr.bf16.mxu0 %v4816_v4  ;;  %1338 = vmatprep.subr.bf16.mxu1 %v4818_v5 }
  0xc4   :  { %894 = vmatmul.mubr.bf16.gmra.mrb[12].mxu0 %v4362_v6  ;;  %1040 = vmatmul.mubr.bf16.gmra.mrb[12].mxu1 %v4362_v6 }
  0xc5   :  { %1298 = vmatpush1.bf16.msra.mxu0 %v4824_v7  ;;  %1339 = vmatpush1.bf16.msra.mxu1 %v4826_v8 }
  0xc6   :  { %1299 = vmatprep.subr.bf16.mxu0 %v4830_v9  ;;  %1340 = vmatprep.subr.bf16.mxu1 %v4832_v10 }
  0xc7   :  { %1317 = vmatprep.mubr.bf16.mxu0 %v5291_v42  ;;  %1358 = vmatprep.mubr.bf16.mxu1 %v5291_v42 }
  0xc9   :  { %1300 = vmatpush1.bf16.msra.mxu0 %v4836_v11  ;;  %1341 = vmatpush1.bf16.msra.mxu1 %v4838_v12 }
  0xca   :  { %1593 = vmatprep.subr.bf16.mxu0 %v4740_v40  ;;  %1634 = vmatprep.subr.bf16.mxu1 %v4742_v41 }
  0xcc   :  { %1318 = vmatmul.mubr.bf16.vlgmr.msra.gmra.mrb[16].mxu0 %v4640_v13  ;;  %1359 = vmatmul.mubr.bf16.vlgmr.msra.gmra.mrb[16].mxu1 %v4640_v13 }
  0xcd   :  { %1594 = vmatpush1.bf16.msra.mxu0 %v4746_v44  ;;  %1635 = vmatpush1.bf16.msra.mxu1 %v4748_v45 }
  0xce   :  { %1595 = vmatprep.subr.bf16.mxu0 %v4750_v46  ;;  %1636 = vmatprep.subr.bf16.mxu1 %v4752_v47 }
  0xcf   :  { %1625 = vmatprep.mubr.bf16.mxu0 %v5291_v42  ;;  %1666 = vmatprep.mubr.bf16.mxu1 %v5291_v42 }
  0xd1   :  { %1596 = vmatpush1.bf16.msra.mxu0 %v4756_v48  ;;  %1637 = vmatpush1.bf16.msra.mxu1 %v4758_v49 }
  0xd2   :  { %1597 = vmatprep.subr.bf16.mxu0 %v4760_v50  ;;  %1638 = vmatprep.subr.bf16.mxu1 %v4762_v51 }
  0xd5   :  { %1598 = vmatpush1.bf16.msra.mxu0 %v4770_v53  ;;  %1639 = vmatpush1.bf16.msra.mxu1 %v4772_v54 }
  0xd6   :  { %1599 = vmatprep.subr.bf16.mxu0 %v4774_v55  ;;  %1640 = vmatprep.subr.bf16.mxu1 %v4776_v56 }
  0xd9   :  { %1600 = vmatpush1.bf16.msra.mxu0 %v4782_v57  ;;  %1641 = vmatpush1.bf16.msra.mxu1 %v4784_v58 }
  0xda   :  { %1601 = vmatprep.subr.bf16.mxu0 %v4786_v59  ;;  %1642 = vmatprep.subr.bf16.mxu1 %v4788_v60 }
  0xdd   :  { %1602 = vmatpush1.bf16.msra.mxu0 %v4798_v62  ;;  %1643 = vmatpush1.bf16.msra.mxu1 %v4800_v63 }
  0xde   :  { %1603 = vmatprep.subr.bf16.mxu0 %v4804_v0  ;;  %1644 = vmatprep.subr.bf16.mxu1 %v4806_v1 }
  0xe1   :  { %1604 = vmatpush1.bf16.msra.mxu0 %v4810_v2  ;;  %1645 = vmatpush1.bf16.msra.mxu1 %v4812_v3 }
  0xe2   :  { %1605 = vmatprep.subr.bf16.mxu0 %v4816_v4  ;;  %1646 = vmatprep.subr.bf16.mxu1 %v4818_v5 }
  0xe5   :  { %1606 = vmatpush1.bf16.msra.mxu0 %v4824_v7  ;;  %1647 = vmatpush1.bf16.msra.mxu1 %v4826_v8 }
  0xe6   :  { %1607 = vmatprep.subr.bf16.mxu0 %v4830_v9  ;;  %1648 = vmatprep.subr.bf16.mxu1 %v4832_v10 }
  0xe9   :  { %1608 = vmatpush1.bf16.msra.mxu0 %v4836_v11  ;;  %1649 = vmatpush1.bf16.msra.mxu1 %v4838_v12 }
  0xea   :  { %1901 = vmatprep.subr.bf16.mxu0 %v4740_v40  ;;  %1942 = vmatprep.subr.bf16.mxu1 %v4742_v41 }
 0x17f   :  { %v4885_v21 = vpop.f32.mrb[0].mxu0  ;;  %v4887_v22 = vpop.f32.mrb[0].mxu1 }
 0x180   :  { %v867_v25 = vpop.f32.mrb[1].mxu0  ;;  %v1013_v26 = vpop.f32.mrb[1].mxu1 }
 0x181   :  { %v869_v29 = vpop.f32.mrb[2].mxu0  ;;  %v1015_v30 = vpop.f32.mrb[2].mxu1 }
 0x182   :  { %v4889_v31 = vadd.f32 %v869_v29, %v197_v23  ;;  %v4891_v32 = vadd.f32 %v1015_v30, %v205_v24  ;;  %v871_v33 = vpop.f32.mrb[3].mxu0  ;;  %v1017_v34 = vpop.f32.mrb[3].mxu1 }
 0x183   :  { %v4893_v35 = vadd.f32 %v871_v33, %v201_v27  ;;  %v4895_v36 = vadd.f32 %v1017_v34, %v209_v28 }
 0x187   :  { %v875_v37 = vpop.f32.mrb[4].mxu0  ;;  %v1021_v38 = vpop.f32.mrb[4].mxu1 }
 0x188   :  { %v4897_v39 = vadd.f32 %v875_v37, %v197_v23  ;;  %v4899_v43 = vadd.f32 %v1021_v38, %v205_v24  ;;  %v877_v52 = vpop.f32.mrb[5].mxu0  ;;  %v1023_v61 = vpop.f32.mrb[5].mxu1 }
 0x189   :  { %v4901_v6 = vadd.f32 %v877_v52, %v201_v27  ;;  %v4903_v13 = vadd.f32 %v1023_v61, %v209_v28  ;;  %v879_v14 = vpop.f32.mrb[6].mxu0  ;;  %v1025_v15 = vpop.f32.mrb[6].mxu1 }
 0x18a   :  { %v4905_v16 = vadd.f32 %v879_v14, %v197_v23  ;;  %v4907_v17 = vadd.f32 %v1025_v15, %v205_v24  ;;  %v881_v18 = vpop.f32.mrb[7].mxu0  ;;  %v1027_v19 = vpop.f32.mrb[7].mxu1 }
 0x18b   :  { %5293 = vst [vmem:[#allocation18_spill] sm:$0xff] %v4901_v6  ;;  %5294 = vst [vmem:[#allocation19_spill] sm:$0xff] %v4903_v13  ;;  %v4909_v20 = vadd.f32 %v881_v18, %v201_v27  ;;  %v4911_v29 = vadd.f32 %v1027_v19, %v209_v28 }
 0x18c   :  { %5295 = vst [vmem:[#allocation20_spill] sm:$0xff] %v4905_v16  ;;  %5296 = vst [vmem:[#allocation21_spill] sm:$0xff] %v4907_v17 }
 0x18d   :  { %5297 = vst [vmem:[#allocation22_spill] sm:$0xff] %v4909_v20  ;;  %5298 = vst [vmem:[#allocation23_spill] sm:$0xff] %v4911_v29 }
 0x18f   :  { %v885_v30 = vpop.f32.mrb[8].mxu0  ;;  %v1031_v33 = vpop.f32.mrb[8].mxu1 }
 0x190   :  { %v4913_v34 = vadd.f32 %v885_v30, %v197_v23  ;;  %v4915_v37 = vadd.f32 %v1031_v33, %v205_v24  ;;  %v887_v38 = vpop.f32.mrb[9].mxu0  ;;  %v1033_v52 = vpop.f32.mrb[9].mxu1 }
 0x191   :  { %v4917_v61 = vadd.f32 %v887_v38, %v201_v27  ;;  %v4919_v14 = vadd.f32 %v1033_v52, %v209_v28  ;;  %v889_v15 = vpop.f32.mrb[10].mxu0  ;;  %v1035_v42 = vpop.f32.mrb[10].mxu1 }
 0x192   :  { %5299 = vst [vmem:[#allocation24_spill] sm:$0xff] %v4913_v34  ;;  %5300 = vst [vmem:[#allocation25_spill] sm:$0xff] %v4915_v37  ;;  %v4921_v17 = vadd.f32 %v889_v15, %v197_v23  ;;  %v4923_v18 = vadd.f32 %v1035_v42, %v205_v24  ;;  %v891_v19 = vpop.f32.mrb[11].mxu0  ;;  %v1037_v29 = vpop.f32.mrb[11].mxu1 }
 0x193   :  { %5301 = vst [vmem:[#allocation26_spill] sm:$0xff] %v4917_v61  ;;  %5302 = vst [vmem:[#allocation27_spill] sm:$0xff] %v4919_v14  ;;  %v4925_v20 = vadd.f32 %v891_v19, %v201_v27  ;;  %v4927_v30 = vadd.f32 %v1037_v29, %v209_v28 }
 0x194   :  { %5303 = vst [vmem:[#allocation28_spill] sm:$0xff] %v4921_v17  ;;  %5304 = vst [vmem:[#allocation29_spill] sm:$0xff] %v4923_v18 }
 0x195   :  { %5305 = vst [vmem:[#allocation30_spill] sm:$0xff] %v4925_v20  ;;  %5306 = vst [vmem:[#allocation31_spill] sm:$0xff] %v4927_v30 }
 0x197   :  { %v895_v33 = vpop.f32.mrb[12].mxu0  ;;  %v1041_v37 = vpop.f32.mrb[12].mxu1 }
 0x198   :  { %v4929_v34 = vadd.f32 %v895_v33, %v197_v23  ;;  %v4931_v38 = vadd.f32 %v1041_v37, %v205_v24  ;;  %v897_v52 = vpop.f32.mrb[13].mxu0  ;;  %v1043_v14 = vpop.f32.mrb[13].mxu1  ;;  %v4088_v37 = vadd.f32 %v4885_v21, %v197_v23 }
 0x199   :  { %v4933_v61 = vadd.f32 %v897_v52, %v201_v27  ;;  %v4935_v15 = vadd.f32 %v1043_v14, %v209_v28  ;;  %v899_v42 = vpop.f32.mrb[14].mxu0  ;;  %v1045_v18 = vpop.f32.mrb[14].mxu1  ;;  %v4089_v52 = vadd.f32 %v867_v25, %v201_v27 }
 0x19a   :  { %5307 = vst [vmem:[#allocation32_spill] sm:$0xff] %v4929_v34  ;;  %5308 = vst [vmem:[#allocation33_spill] sm:$0xff] %v4931_v38  ;;  %v4937_v17 = vadd.f32 %v899_v42, %v197_v23  ;;  %v4939_v19 = vadd.f32 %v1045_v18, %v205_v24  ;;  %v901_v29 = vpop.f32.mrb[15].mxu0  ;;  %v1047_v30 = vpop.f32.mrb[15].mxu1  ;;  %v4104_v38 = vadd.f32 %v4887_v22, %v205_v24 }
 0x19b   :  { %5309 = vst [vmem:[#allocation34_spill] sm:$0xff] %v4933_v61  ;;  %5310 = vst [vmem:[#allocation35_spill] sm:$0xff] %v4935_v15  ;;  %v4941_v20 = vadd.f32 %v901_v29, %v201_v27  ;;  %v4943_v33 = vadd.f32 %v1047_v30, %v209_v28  ;;  %v4105_v61 = vadd.f32 %v1013_v26, %v209_v28 }
 0x19c   :  { %5311 = vst [vmem:[#allocation36_spill] sm:$0xff] %v4937_v17  ;;  %5312 = vst [vmem:[#allocation37_spill] sm:$0xff] %v4939_v19 }
 0x19d   :  { %5313 = vst [vmem:[#allocation38_spill] sm:$0xff] %v4941_v20  ;;  %5314 = vst [vmem:[#allocation39_spill] sm:$0xff] %v4943_v33 }
 0x19f   :  { %v1319_v14 = vpop.f32.mrb[16].mxu0  ;;  %v1360_v15 = vpop.f32.mrb[16].mxu1 }
 0x1a0   :  { %v1367_v34 = vadd.f32 %v4088_v37, %v1319_v14  ;;  %v1369_v16 = vadd.f32 %v4104_v38, %v1360_v15  ;;  %v1321_v42 = vpop.f32.mrb[17].mxu0  ;;  %v1362_v17 = vpop.f32.mrb[17].mxu1 }
 0x1a1   :  { %v1368_v18 = vadd.f32 %v4089_v52, %v1321_v42  ;;  %v1370_v19 = vadd.f32 %v4105_v61, %v1362_v17  ;;  %v1323_v13 = vpop.f32.mrb[18].mxu0  ;;  %v1364_v6 = vpop.f32.mrb[18].mxu1 }
 0x1a2   :  { %v1371_v29 = vmul.f32 0.5, %v1367_v34  ;;  %v1324_v20 = vpop.f32.mrb[19].mxu0  ;;  %v1365_v30 = vpop.f32.mrb[19].mxu1 }
 0x1a3   :  { %v1375_v33 = vmul.f32 0.5, %v1368_v18  ;;  %v1380_v21 = vmul.f32 0.5, %v1370_v19  ;;  %v5315_v19 = vmov 0  }
 0x1a4   :  { %4431 = vtanh.f32 %v1371_v29 }
 0x1a5   :  { %4433 = vtanh.f32 %v1375_v33 }
 0x1a6   :  { %4435 = vtanh.f32 %v1369_v16 }
 0x1a7   :  { %4437 = vtanh.f32 %v1380_v21 }
 0x1ae   :  { %v4432_v22 = vpop.eup %4431 }
 0x1af   :  { %v4434_v23 = vpop.eup %4433  ;;  %v1373_v24 = vadd.f32 1.0, %v4432_v22 }
 0x1b0   :  { %v1377_v25 = vadd.f32 1.0, %v4434_v23  ;;  %v4436_v27 = vpop.eup %4435 }
 0x1b1   :  { %v1374_v26 = vmul.f32 0.5, %v1373_v24  ;;  %v4438_v6 = vpop.eup %4437 }
 0x1b2   :  { %v1378_v28 = vmul.f32 0.5, %v1377_v25  ;;  %v1382_v20 = vadd.f32 1.0, %v4438_v6 }
 0x1b3   :  { %v1386_v38 = vmul.f32 %v4436_v27, %v1374_v26 }
 0x1b4   :  { %v1385_v17 = vmul.f32 0.0, %v1378_v28  ;;  %v1383_v34 = vmul.f32 0.5, %v1382_v20 }
 0x1b6   :  { %v4947_v13 = vadd.f32 %v1386_v38, %v1385_v17 }
 0x1b8   :  { %4439 = vtanh.f32 %v4947_v13 }
 0x1c2   :  { %v4440_v61 = vpop.eup %4439 }
 0x1c3   :  { %v1389_v16 = vmul.f32 %v4440_v61, %v1383_v34 }
 0x1c5   :  { %v1400_v15 = vpack.c.bf16 %v1389_v16, %v1389_v16 }
 0x1c7   :  { %1626 = vmatmul.mubr.bf16.vlgmr.msra.gmra.mrb[20].mxu0 %v1400_v15  ;;  %1667 = vmatmul.mubr.bf16.vlgmr.msra.gmra.mrb[20].mxu1 %v1400_v15 }
 0x1c8   :  { %1902 = vmatpush1.bf16.msra.mxu0 %v4746_v44  ;;  %1943 = vmatpush1.bf16.msra.mxu1 %v4748_v45 }
 0x1c9   :  { %1903 = vmatprep.subr.bf16.mxu0 %v4750_v46  ;;  %1944 = vmatprep.subr.bf16.mxu1 %v4752_v47 }
 0x1ca   :  { %1933 = vmatprep.mubr.bf16.mxu0 %v5315_v19  ;;  %1974 = vmatprep.mubr.bf16.mxu1 %v5315_v19 }
 0x1cc   :  { %1904 = vmatpush1.bf16.msra.mxu0 %v4756_v48  ;;  %1945 = vmatpush1.bf16.msra.mxu1 %v4758_v49 }
 0x1cd   :  { %1905 = vmatprep.subr.bf16.mxu0 %v4760_v50  ;;  %1946 = vmatprep.subr.bf16.mxu1 %v4762_v51 }
 0x1d0   :  { %1906 = vmatpush1.bf16.msra.mxu0 %v4770_v53  ;;  %1947 = vmatpush1.bf16.msra.mxu1 %v4772_v54 }
 0x1d1   :  { %1907 = vmatprep.subr.bf16.mxu0 %v4774_v55  ;;  %1948 = vmatprep.subr.bf16.mxu1 %v4776_v56 }
 0x1d4   :  { %1908 = vmatpush1.bf16.msra.mxu0 %v4782_v57  ;;  %1949 = vmatpush1.bf16.msra.mxu1 %v4784_v58 }
 0x1d5   :  { %1909 = vmatprep.subr.bf16.mxu0 %v4786_v59  ;;  %1950 = vmatprep.subr.bf16.mxu1 %v4788_v60 }
 0x1d8   :  { %1910 = vmatpush1.bf16.msra.mxu0 %v4798_v62  ;;  %1951 = vmatpush1.bf16.msra.mxu1 %v4800_v63 }
 0x1d9   :  { %1911 = vmatprep.subr.bf16.mxu0 %v4804_v0  ;;  %1952 = vmatprep.subr.bf16.mxu1 %v4806_v1 }
 0x1dc   :  { %1912 = vmatpush1.bf16.msra.mxu0 %v4810_v2  ;;  %1953 = vmatpush1.bf16.msra.mxu1 %v4812_v3 }
 0x1dd   :  { %1913 = vmatprep.subr.bf16.mxu0 %v4816_v4  ;;  %1954 = vmatprep.subr.bf16.mxu1 %v4818_v5 }
 0x1e0   :  { %1914 = vmatpush1.bf16.msra.mxu0 %v4824_v7  ;;  %1955 = vmatpush1.bf16.msra.mxu1 %v4826_v8 }
 0x1e1   :  { %1915 = vmatprep.subr.bf16.mxu0 %v4830_v9  ;;  %1956 = vmatprep.subr.bf16.mxu1 %v4832_v10 }
 0x1e4   :  { %1916 = vmatpush1.bf16.msra.mxu0 %v4836_v11  ;;  %1957 = vmatpush1.bf16.msra.mxu1 %v4838_v12 }
 0x1e5   :  { %2209 = vmatprep.subr.bf16.mxu0 %v4740_v40  ;;  %2250 = vmatprep.subr.bf16.mxu1 %v4742_v41 }
 0x29a   :  { %v1627_v33 = vpop.f32.mrb[20].mxu0  ;;  %v1668_v37 = vpop.f32.mrb[20].mxu1 }
 0x29b   :  { %v1675_v52 = vadd.f32 %v4889_v31, %v1627_v33  ;;  %v1677_v14 = vadd.f32 %v4891_v32, %v1668_v37  ;;  %v1629_v42 = vpop.f32.mrb[21].mxu0  ;;  %v1670_v18 = vpop.f32.mrb[21].mxu1  ;;  %v5034_v37 = vld [vmem:[#allocation10 + $0x4] ss:$16 sps:$4 sm:$0xff]  }
 0x29c   :  { %v1676_v29 = vadd.f32 %v4893_v35, %v1629_v42  ;;  %v1678_v30 = vadd.f32 %v4895_v36, %v1670_v18  ;;  %v1631_v21 = vpop.f32.mrb[22].mxu0  ;;  %v1672_v22 = vpop.f32.mrb[22].mxu1  ;;  %v5040_v42 = vld [vmem:[#allocation10 + $0x8] ss:$16 sps:$4 sm:$0xff]   ;;  %v5046_v18 = vld [vmem:[#allocation10 + $0x24] ss:$16 sps:$4 sm:$0xff]  }
 0x29d   :  { %v1679_v23 = vmul.f32 0.5, %v1675_v52  ;;  %v1632_v24 = vpop.f32.mrb[23].mxu0  ;;  %v1673_v25 = vpop.f32.mrb[23].mxu1  ;;  %v5036_v52 = vld [vmem:[#allocation10 + $0xc] ss:$16 sps:$4 sm:$0xff]  }
 0x29e   :  { %v1683_v40 = vmul.f32 0.5, %v1676_v29  ;;  %v1688_v41 = vmul.f32 0.5, %v1678_v30  ;;  %v5048_v29 = vld [vmem:[#allocation10 + $0x2c] ss:$16 sps:$4 sm:$0xff]   ;;  %v5050_v30 = vld [vmem:[#allocation10 + $0x20] ss:$16 sps:$4 sm:$0xff]  }
 0x29f   :  { %4441 = vtanh.f32 %v1679_v23  ;;  %v5052_v21 = vld [vmem:[#allocation10 + $0x28] ss:$16 sps:$4 sm:$0xff]   ;;  %v5058_v22 = vld [vmem:[#allocation10 + $0x44] ss:$16 sps:$4 sm:$0xff]   ;;  %v5060_v23 = vld [vmem:[#allocation10 + $0x4c] ss:$16 sps:$4 sm:$0xff]  }
 0x2a0   :  { %4443 = vtanh.f32 %v1683_v40  ;;  %v5062_v24 = vld [vmem:[#allocation10 + $0x40] ss:$16 sps:$4 sm:$0xff]   ;;  %v5064_v25 = vld [vmem:[#allocation10 + $0x48] ss:$16 sps:$4 sm:$0xff]   ;;  %v5070_v40 = vld [vmem:[#allocation10 + $0x64] ss:$16 sps:$4 sm:$0xff]  }
 0x2a1   :  { %4445 = vtanh.f32 %v1677_v14  ;;  %v5038_v14 = vld [vmem:[#allocation10] ss:$16 sps:$4 sm:$0xff]  }
 0x2a2   :  { %4447 = vtanh.f32 %v1688_v41  ;;  %v5072_v41 = vld [vmem:[#allocation10 + $0x6c] ss:$16 sps:$4 sm:$0xff]  }
 0x2a9   :  { %v4442_v26 = vpop.eup %4441 }
 0x2aa   :  { %v4444_v31 = vpop.eup %4443  ;;  %v1681_v27 = vadd.f32 1.0, %v4442_v26  ;;  %v5074_v26 = vld [vmem:[#allocation10 + $0x60] ss:$16 sps:$4 sm:$0xff]  }
 0x2ab   :  { %v1685_v32 = vadd.f32 1.0, %v4444_v31  ;;  %v4446_v38 = vpop.eup %4445  ;;  %v5076_v31 = vld [vmem:[#allocation10 + $0x68] ss:$16 sps:$4 sm:$0xff]  }
 0x2ac   :  { %v1682_v28 = vmul.f32 0.5, %v1681_v27  ;;  %v4448_v20 = vpop.eup %4447  ;;  %v5082_v27 = vld [vmem:[#allocation10 + $0x84] ss:$16 sps:$4 sm:$0xff]  }
 0x2ad   :  { %v1686_v35 = vmul.f32 0.5, %v1685_v32  ;;  %v1690_v34 = vadd.f32 1.0, %v4448_v20  ;;  %v5084_v32 = vld [vmem:[#allocation10 + $0x8c] ss:$16 sps:$4 sm:$0xff]   ;;  %v5106_v20 = vld [vmem:[#allocation10 + $0xc4] ss:$16 sps:$4 sm:$0xff]  }
 0x2ae   :  { %v1694_v17 = vmul.f32 %v4446_v38, %v1682_v28  ;;  %v5086_v28 = vld [vmem:[#allocation10 + $0x80] ss:$16 sps:$4 sm:$0xff]   ;;  %v5088_v38 = vld [vmem:[#allocation10 + $0x88] ss:$16 sps:$4 sm:$0xff]  }
 0x2af   :  { %v1693_v36 = vmul.f32 %v1686_v35, %v4947_v13  ;;  %v1691_v61 = vmul.f32 0.5, %v1690_v34  ;;  %v5094_v35 = vld [vmem:[#allocation10 + $0xa4] ss:$16 sps:$4 sm:$0xff]   ;;  %v5108_v34 = vld [vmem:[#allocation10 + $0xcc] ss:$16 sps:$4 sm:$0xff]  }
 0x2b1   :  { %v4989_v6 = vadd.f32 %v1694_v17, %v1693_v36  ;;  %v5096_v17 = vld [vmem:[#allocation10 + $0xac] ss:$16 sps:$4 sm:$0xff]   ;;  %v5098_v36 = vld [vmem:[#allocation10 + $0xa0] ss:$16 sps:$4 sm:$0xff]  }
 0x2b3   :  { %4449 = vtanh.f32 %v4989_v6 }
 0x2bd   :  { %v4450_v16 = vpop.eup %4449 }
 0x2be   :  { %v1697_v15 = vmul.f32 %v4450_v16, %v1691_v61  ;;  %v5110_v61 = vld [vmem:[#allocation10 + $0xc0] ss:$16 sps:$4 sm:$0xff]   ;;  %v5112_v16 = vld [vmem:[#allocation10 + $0xc8] ss:$16 sps:$4 sm:$0xff]  }
 0x2c0   :  { %v1708_v33 = vpack.c.bf16 %v1697_v15, %v1697_v15  ;;  %v5118_v15 = vld [vmem:[#allocation10 + $0xe4] ss:$16 sps:$4 sm:$0xff]  }
 0x2c2   :  { %1934 = vmatmul.mubr.bf16.vlgmr.msra.gmra.mrb[24].mxu0 %v1708_v33  ;;  %1975 = vmatmul.mubr.bf16.vlgmr.msra.gmra.mrb[24].mxu1 %v1708_v33  ;;  %v5120_v33 = vld [vmem:[#allocation10 + $0xec] ss:$16 sps:$4 sm:$0xff]  }
 0x2c3   :  { %2210 = vmatpush1.bf16.msra.mxu0 %v4746_v44  ;;  %2251 = vmatpush1.bf16.msra.mxu1 %v4748_v45 }
 0x2c4   :  { %2211 = vmatprep.subr.bf16.mxu0 %v4750_v46  ;;  %2252 = vmatprep.subr.bf16.mxu1 %v4752_v47 }
 0x2c5   :  { %2241 = vmatprep.mubr.bf16.mxu0 %v5315_v19  ;;  %2282 = vmatprep.mubr.bf16.mxu1 %v5315_v19 }
 0x2c7   :  { %2212 = vmatpush1.bf16.msra.mxu0 %v4756_v48  ;;  %2253 = vmatpush1.bf16.msra.mxu1 %v4758_v49 }
 0x2c8   :  { %2213 = vmatprep.subr.bf16.mxu0 %v4760_v50  ;;  %2254 = vmatprep.subr.bf16.mxu1 %v4762_v51  ;;  %v5316_v50 = vld [vmem:[#allocation18_spill] sm:$0xff] }
 0x2cb   :  { %2214 = vmatpush1.bf16.msra.mxu0 %v4770_v53  ;;  %2255 = vmatpush1.bf16.msra.mxu1 %v4772_v54  ;;  %v5317_v53 = vld [vmem:[#allocation19_spill] sm:$0xff] }
 0x2cc   :  { %2215 = vmatprep.subr.bf16.mxu0 %v4774_v55  ;;  %2256 = vmatprep.subr.bf16.mxu1 %v4776_v56 }
 0x2cf   :  { %2216 = vmatpush1.bf16.msra.mxu0 %v4782_v57  ;;  %2257 = vmatpush1.bf16.msra.mxu1 %v4784_v58 }
 0x2d0   :  { %2217 = vmatprep.subr.bf16.mxu0 %v4786_v59  ;;  %2258 = vmatprep.subr.bf16.mxu1 %v4788_v60 }
 0x2d3   :  { %2218 = vmatpush1.bf16.msra.mxu0 %v4798_v62  ;;  %2259 = vmatpush1.bf16.msra.mxu1 %v4800_v63 }
 0x2d4   :  { %2219 = vmatprep.subr.bf16.mxu0 %v4804_v0  ;;  %2260 = vmatprep.subr.bf16.mxu1 %v4806_v1 }
 0x2d7   :  { %2220 = vmatpush1.bf16.msra.mxu0 %v4810_v2  ;;  %2261 = vmatpush1.bf16.msra.mxu1 %v4812_v3 }
 0x2d8   :  { %2221 = vmatprep.subr.bf16.mxu0 %v4816_v4  ;;  %2262 = vmatprep.subr.bf16.mxu1 %v4818_v5 }
 0x2db   :  { %2222 = vmatpush1.bf16.msra.mxu0 %v4824_v7  ;;  %2263 = vmatpush1.bf16.msra.mxu1 %v4826_v8 }
 0x2dc   :  { %2223 = vmatprep.subr.bf16.mxu0 %v4830_v9  ;;  %2264 = vmatprep.subr.bf16.mxu1 %v4832_v10 }
 0x2df   :  { %2224 = vmatpush1.bf16.msra.mxu0 %v4836_v11  ;;  %2265 = vmatpush1.bf16.msra.mxu1 %v4838_v12 }
 0x2e0   :  { %2517 = vmatprep.subr.bf16.mxu0 %v5034_v37  ;;  %2558 = vmatprep.subr.bf16.mxu1 %v5036_v52 }
 0x395   :  { %v1935_v44 = vpop.f32.mrb[24].mxu0  ;;  %v1976_v45 = vpop.f32.mrb[24].mxu1 }
 0x396   :  { %v1983_v46 = vadd.f32 %v4897_v39, %v1935_v44  ;;  %v1985_v47 = vadd.f32 %v4899_v43, %v1976_v45  ;;  %v1937_v48 = vpop.f32.mrb[25].mxu0  ;;  %v1978_v49 = vpop.f32.mrb[25].mxu1  ;;  %v5122_v44 = vld [vmem:[#allocation10 + $0xe0] ss:$16 sps:$4 sm:$0xff]   ;;  %v5124_v45 = vld [vmem:[#allocation10 + $0xe8] ss:$16 sps:$4 sm:$0xff]  }
 0x397   :  { %v1984_v51 = vadd.f32 %v5316_v50, %v1937_v48  ;;  %v1986_v54 = vadd.f32 %v5317_v53, %v1978_v49  ;;  %v1939_v55 = vpop.f32.mrb[26].mxu0  ;;  %v1980_v56 = vpop.f32.mrb[26].mxu1  ;;  %v5318_v48 = vld [vmem:[#allocation20_spill] sm:$0xff]  ;;  %v5319_v50 = vld [vmem:[#allocation21_spill] sm:$0xff] }
 0x398   :  { %v1987_v57 = vmul.f32 0.5, %v1983_v46  ;;  %v1940_v58 = vpop.f32.mrb[27].mxu0  ;;  %v1981_v59 = vpop.f32.mrb[27].mxu1  ;;  %v5320_v55 = vld [vmem:[#allocation22_spill] sm:$0xff] }
 0x399   :  { %v1991_v60 = vmul.f32 0.5, %v1984_v51  ;;  %v1996_v62 = vmul.f32 0.5, %v1986_v54 }
 0x39a   :  { %4451 = vtanh.f32 %v1987_v57  ;;  %v5321_v57 = vld [vmem:[#allocation23_spill] sm:$0xff] }
 0x39b   :  { %4453 = vtanh.f32 %v1991_v60 }
 0x39c   :  { %4455 = vtanh.f32 %v1985_v47 }
 0x39d   :  { %4457 = vtanh.f32 %v1996_v62 }
 0x3a4   :  { %v4452_v63 = vpop.eup %4451 }
 0x3a5   :  { %v4454_v0 = vpop.eup %4453  ;;  %v1989_v1 = vadd.f32 1.0, %v4452_v63 }
 0x3a6   :  { %v1993_v2 = vadd.f32 1.0, %v4454_v0  ;;  %v4456_v4 = vpop.eup %4455 }
 0x3a7   :  { %v1990_v3 = vmul.f32 0.5, %v1989_v1  ;;  %v4458_v10 = vpop.eup %4457 }
 0x3a8   :  { %v1994_v5 = vmul.f32 0.5, %v1993_v2  ;;  %v1998_v11 = vadd.f32 1.0, %v4458_v10 }
 0x3a9   :  { %v2002_v7 = vmul.f32 %v4456_v4, %v1990_v3 }
 0x3aa   :  { %v2001_v8 = vmul.f32 %v1994_v5, %v4989_v6  ;;  %v1999_v12 = vmul.f32 0.5, %v1998_v11  ;;  %v5100_v6 = vld [vmem:[#allocation10 + $0xa8] ss:$16 sps:$4 sm:$0xff]  }
 0x3ac   :  { %v5029_v9 = vadd.f32 %v2002_v7, %v2001_v8 }
 0x3ae   :  { %4459 = vtanh.f32 %v5029_v9 }
 0x3b8   :  { %v4460_v39 = vpop.eup %4459 }
 0x3b9   :  { %v2005_v43 = vmul.f32 %v4460_v39, %v1999_v12 }
 0x3bb   :  { %v2016_v13 = vpack.c.bf16 %v2005_v43, %v2005_v43 }
 0x3bd   :  { %2242 = vmatmul.mubr.bf16.vlgmr.msra.gmra.mrb[28].mxu0 %v2016_v13  ;;  %2283 = vmatmul.mubr.bf16.vlgmr.msra.gmra.mrb[28].mxu1 %v2016_v13 }
 0x3be   :  { %2549 = vmatprep.mubr.bf16.mxu0 %v5315_v19  ;;  %2590 = vmatprep.mubr.bf16.mxu1 %v5315_v19 }
 0x3bf   :  { %2518 = vmatpush1.bf16.msra.mxu0 %v5038_v14  ;;  %2559 = vmatpush1.bf16.msra.mxu1 %v5040_v42 }
 0x3c0   :  { %2519 = vmatprep.subr.bf16.mxu0 %v5046_v18  ;;  %2560 = vmatprep.subr.bf16.mxu1 %v5048_v29 }
 0x3c3   :  { %2520 = vmatpush1.bf16.msra.mxu0 %v5050_v30  ;;  %2561 = vmatpush1.bf16.msra.mxu1 %v5052_v21 }
 0x3c4   :  { %2521 = vmatprep.subr.bf16.mxu0 %v5058_v22  ;;  %2562 = vmatprep.subr.bf16.mxu1 %v5060_v23 }
 0x3c7   :  { %2522 = vmatpush1.bf16.msra.mxu0 %v5062_v24  ;;  %2563 = vmatpush1.bf16.msra.mxu1 %v5064_v25 }
 0x3c8   :  { %2523 = vmatprep.subr.bf16.mxu0 %v5070_v40  ;;  %2564 = vmatprep.subr.bf16.mxu1 %v5072_v41 }
 0x3cb   :  { %2524 = vmatpush1.bf16.msra.mxu0 %v5074_v26  ;;  %2565 = vmatpush1.bf16.msra.mxu1 %v5076_v31 }
 0x3cc   :  { %2525 = vmatprep.subr.bf16.mxu0 %v5082_v27  ;;  %2566 = vmatprep.subr.bf16.mxu1 %v5084_v32 }
 0x3cf   :  { %2526 = vmatpush1.bf16.msra.mxu0 %v5086_v28  ;;  %2567 = vmatpush1.bf16.msra.mxu1 %v5088_v38 }
 0x3d0   :  { %2527 = vmatprep.subr.bf16.mxu0 %v5094_v35  ;;  %2568 = vmatprep.subr.bf16.mxu1 %v5096_v17 }
 0x3d3   :  { %2528 = vmatpush1.bf16.msra.mxu0 %v5098_v36  ;;  %2569 = vmatpush1.bf16.msra.mxu1 %v5100_v6 }
 0x3d4   :  { %2529 = vmatprep.subr.bf16.mxu0 %v5106_v20  ;;  %2570 = vmatprep.subr.bf16.mxu1 %v5108_v34 }
 0x3d7   :  { %2530 = vmatpush1.bf16.msra.mxu0 %v5110_v61  ;;  %2571 = vmatpush1.bf16.msra.mxu1 %v5112_v16 }
 0x3d8   :  { %2531 = vmatprep.subr.bf16.mxu0 %v5118_v15  ;;  %2572 = vmatprep.subr.bf16.mxu1 %v5120_v33 }
 0x3db   :  { %2532 = vmatpush1.bf16.msra.mxu0 %v5122_v44  ;;  %2573 = vmatpush1.bf16.msra.mxu1 %v5124_v45 }
 0x3dc   :  { %2825 = vmatprep.subr.bf16.mxu0 %v5034_v37  ;;  %2866 = vmatprep.subr.bf16.mxu1 %v5036_v52 }
 0x490   :  { %v2243_v46 = vpop.f32.mrb[28].mxu0  ;;  %v2284_v47 = vpop.f32.mrb[28].mxu1 }
 0x491   :  { %v2291_v49 = vadd.f32 %v5318_v48, %v2243_v46  ;;  %v2293_v51 = vadd.f32 %v5319_v50, %v2284_v47  ;;  %v2245_v53 = vpop.f32.mrb[29].mxu0  ;;  %v2286_v54 = vpop.f32.mrb[29].mxu1 }
 0x492   :  { %v2292_v56 = vadd.f32 %v5320_v55, %v2245_v53  ;;  %v2294_v58 = vadd.f32 %v5321_v57, %v2286_v54  ;;  %v2247_v59 = vpop.f32.mrb[30].mxu0  ;;  %v2288_v60 = vpop.f32.mrb[30].mxu1  ;;  %v5322_v53 = vld [vmem:[#allocation24_spill] sm:$0xff]  ;;  %v5323_v55 = vld [vmem:[#allocation25_spill] sm:$0xff] }
 0x493   :  { %v2295_v62 = vmul.f32 0.5, %v2291_v49  ;;  %v2248_v63 = vpop.f32.mrb[31].mxu0  ;;  %v2289_v0 = vpop.f32.mrb[31].mxu1  ;;  %v5324_v59 = vld [vmem:[#allocation26_spill] sm:$0xff] }
 0x494   :  { %v2299_v1 = vmul.f32 0.5, %v2292_v56  ;;  %v2304_v2 = vmul.f32 0.5, %v2294_v58 }
 0x495   :  { %4461 = vtanh.f32 %v2295_v62  ;;  %v5325_v62 = vld [vmem:[#allocation27_spill] sm:$0xff] }
 0x496   :  { %4463 = vtanh.f32 %v2299_v1 }
 0x497   :  { %4465 = vtanh.f32 %v2293_v51 }
 0x498   :  { %4467 = vtanh.f32 %v2304_v2 }
 0x49f   :  { %v4462_v3 = vpop.eup %4461 }
 0x4a0   :  { %v4464_v4 = vpop.eup %4463  ;;  %v2297_v5 = vadd.f32 1.0, %v4462_v3 }
 0x4a1   :  { %v2301_v7 = vadd.f32 1.0, %v4464_v4  ;;  %v4466_v10 = vpop.eup %4465 }
 0x4a2   :  { %v2298_v8 = vmul.f32 0.5, %v2297_v5  ;;  %v4468_v13 = vpop.eup %4467 }
 0x4a3   :  { %v2302_v11 = vmul.f32 0.5, %v2301_v7  ;;  %v2306_v46 = vadd.f32 1.0, %v4468_v13 }
 0x4a4   :  { %v2310_v12 = vmul.f32 %v4466_v10, %v2298_v8 }
 0x4a5   :  { %v2309_v39 = vmul.f32 %v2302_v11, %v5029_v9  ;;  %v2307_v47 = vmul.f32 0.5, %v2306_v46 }
 0x4a7   :  { %v5137_v43 = vadd.f32 %v2310_v12, %v2309_v39 }
 0x4a9   :  { %4469 = vtanh.f32 %v5137_v43 }
 0x4b3   :  { %v4470_v48 = vpop.eup %4469 }
 0x4b4   :  { %v2313_v49 = vmul.f32 %v4470_v48, %v2307_v47 }
 0x4b6   :  { %v2324_v50 = vpack.c.bf16 %v2313_v49, %v2313_v49 }
 0x4b8   :  { %2550 = vmatmul.mubr.bf16.vlgmr.msra.gmra.mrb[32].mxu0 %v2324_v50  ;;  %2591 = vmatmul.mubr.bf16.vlgmr.msra.gmra.mrb[32].mxu1 %v2324_v50 }
 0x4b9   :  { %2826 = vmatpush1.bf16.msra.mxu0 %v5038_v14  ;;  %2867 = vmatpush1.bf16.msra.mxu1 %v5040_v42 }
 0x4ba   :  { %2827 = vmatprep.subr.bf16.mxu0 %v5046_v18  ;;  %2868 = vmatprep.subr.bf16.mxu1 %v5048_v29 }
 0x4bb   :  { %2857 = vmatprep.mubr.bf16.mxu0 %v5315_v19  ;;  %2898 = vmatprep.mubr.bf16.mxu1 %v5315_v19 }
 0x4bd   :  { %2828 = vmatpush1.bf16.msra.mxu0 %v5050_v30  ;;  %2869 = vmatpush1.bf16.msra.mxu1 %v5052_v21 }
 0x4be   :  { %2829 = vmatprep.subr.bf16.mxu0 %v5058_v22  ;;  %2870 = vmatprep.subr.bf16.mxu1 %v5060_v23 }
 0x4c1   :  { %2830 = vmatpush1.bf16.msra.mxu0 %v5062_v24  ;;  %2871 = vmatpush1.bf16.msra.mxu1 %v5064_v25 }
 0x4c2   :  { %2831 = vmatprep.subr.bf16.mxu0 %v5070_v40  ;;  %2872 = vmatprep.subr.bf16.mxu1 %v5072_v41 }
 0x4c5   :  { %2832 = vmatpush1.bf16.msra.mxu0 %v5074_v26  ;;  %2873 = vmatpush1.bf16.msra.mxu1 %v5076_v31 }
 0x4c6   :  { %2833 = vmatprep.subr.bf16.mxu0 %v5082_v27  ;;  %2874 = vmatprep.subr.bf16.mxu1 %v5084_v32 }
 0x4c9   :  { %2834 = vmatpush1.bf16.msra.mxu0 %v5086_v28  ;;  %2875 = vmatpush1.bf16.msra.mxu1 %v5088_v38 }
 0x4ca   :  { %2835 = vmatprep.subr.bf16.mxu0 %v5094_v35  ;;  %2876 = vmatprep.subr.bf16.mxu1 %v5096_v17 }
 0x4cd   :  { %2836 = vmatpush1.bf16.msra.mxu0 %v5098_v36  ;;  %2877 = vmatpush1.bf16.msra.mxu1 %v5100_v6 }
 0x4ce   :  { %2837 = vmatprep.subr.bf16.mxu0 %v5106_v20  ;;  %2878 = vmatprep.subr.bf16.mxu1 %v5108_v34 }
 0x4d1   :  { %2838 = vmatpush1.bf16.msra.mxu0 %v5110_v61  ;;  %2879 = vmatpush1.bf16.msra.mxu1 %v5112_v16 }
 0x4d2   :  { %2839 = vmatprep.subr.bf16.mxu0 %v5118_v15  ;;  %2880 = vmatprep.subr.bf16.mxu1 %v5120_v33 }
 0x4d5   :  { %2840 = vmatpush1.bf16.msra.mxu0 %v5122_v44  ;;  %2881 = vmatpush1.bf16.msra.mxu1 %v5124_v45 }
 0x4d6   :  { %3133 = vmatprep.subr.bf16.mxu0 %v5034_v37  ;;  %3174 = vmatprep.subr.bf16.mxu1 %v5036_v52 }
 0x58b   :  { %v2551_v9 = vpop.f32.mrb[32].mxu0  ;;  %v2592_v51 = vpop.f32.mrb[32].mxu1 }
 0x58c   :  { %v2599_v54 = vadd.f32 %v5322_v53, %v2551_v9  ;;  %v2601_v56 = vadd.f32 %v5323_v55, %v2592_v51  ;;  %v2553_v57 = vpop.f32.mrb[33].mxu0  ;;  %v2594_v58 = vpop.f32.mrb[33].mxu1 }
 0x58d   :  { %v2600_v60 = vadd.f32 %v5324_v59, %v2553_v57  ;;  %v2602_v63 = vadd.f32 %v5325_v62, %v2594_v58  ;;  %v2555_v0 = vpop.f32.mrb[34].mxu0  ;;  %v2596_v1 = vpop.f32.mrb[34].mxu1  ;;  %v5326_v57 = vld [vmem:[#allocation28_spill] sm:$0xff]  ;;  %v5327_v59 = vld [vmem:[#allocation29_spill] sm:$0xff] }
 0x58e   :  { %v2603_v2 = vmul.f32 0.5, %v2599_v54  ;;  %v2556_v3 = vpop.f32.mrb[35].mxu0  ;;  %v2597_v4 = vpop.f32.mrb[35].mxu1  ;;  %v5328_v0 = vld [vmem:[#allocation30_spill] sm:$0xff] }
 0x58f   :  { %v2607_v5 = vmul.f32 0.5, %v2600_v60  ;;  %v2612_v7 = vmul.f32 0.5, %v2602_v63 }
 0x590   :  { %4471 = vtanh.f32 %v2603_v2  ;;  %v5329_v2 = vld [vmem:[#allocation31_spill] sm:$0xff] }
 0x591   :  { %4473 = vtanh.f32 %v2607_v5 }
 0x592   :  { %4475 = vtanh.f32 %v2601_v56 }
 0x593   :  { %4477 = vtanh.f32 %v2612_v7 }
 0x59a   :  { %v4472_v8 = vpop.eup %4471 }
 0x59b   :  { %v4474_v10 = vpop.eup %4473  ;;  %v2605_v11 = vadd.f32 1.0, %v4472_v8 }
 0x59c   :  { %v2609_v12 = vadd.f32 1.0, %v4474_v10  ;;  %v4476_v13 = vpop.eup %4475 }
 0x59d   :  { %v2606_v39 = vmul.f32 0.5, %v2605_v11  ;;  %v4478_v50 = vpop.eup %4477 }
 0x59e   :  { %v2610_v46 = vmul.f32 0.5, %v2609_v12  ;;  %v2614_v9 = vadd.f32 1.0, %v4478_v50 }
 0x59f   :  { %v2618_v47 = vmul.f32 %v4476_v13, %v2606_v39 }
 0x5a0   :  { %v2617_v48 = vmul.f32 %v2610_v46, %v5137_v43  ;;  %v2615_v51 = vmul.f32 0.5, %v2614_v9 }
 0x5a2   :  { %v5179_v49 = vadd.f32 %v2618_v47, %v2617_v48 }
 0x5a4   :  { %4479 = vtanh.f32 %v5179_v49 }
 0x5ae   :  { %v4480_v53 = vpop.eup %4479 }
 0x5af   :  { %v2621_v54 = vmul.f32 %v4480_v53, %v2615_v51 }
 0x5b1   :  { %v2632_v55 = vpack.c.bf16 %v2621_v54, %v2621_v54 }
 0x5b3   :  { %2858 = vmatmul.mubr.bf16.vlgmr.msra.gmra.mrb[36].mxu0 %v2632_v55  ;;  %2899 = vmatmul.mubr.bf16.vlgmr.msra.gmra.mrb[36].mxu1 %v2632_v55 }
 0x5b4   :  { %3134 = vmatpush1.bf16.msra.mxu0 %v5038_v14  ;;  %3175 = vmatpush1.bf16.msra.mxu1 %v5040_v42 }
 0x5b5   :  { %3135 = vmatprep.subr.bf16.mxu0 %v5046_v18  ;;  %3176 = vmatprep.subr.bf16.mxu1 %v5048_v29 }
 0x5b6   :  { %3165 = vmatprep.mubr.bf16.mxu0 %v5315_v19  ;;  %3206 = vmatprep.mubr.bf16.mxu1 %v5315_v19 }
 0x5b8   :  { %3136 = vmatpush1.bf16.msra.mxu0 %v5050_v30  ;;  %3177 = vmatpush1.bf16.msra.mxu1 %v5052_v21 }
 0x5b9   :  { %3137 = vmatprep.subr.bf16.mxu0 %v5058_v22  ;;  %3178 = vmatprep.subr.bf16.mxu1 %v5060_v23 }
 0x5bc   :  { %3138 = vmatpush1.bf16.msra.mxu0 %v5062_v24  ;;  %3179 = vmatpush1.bf16.msra.mxu1 %v5064_v25 }
 0x5bd   :  { %3139 = vmatprep.subr.bf16.mxu0 %v5070_v40  ;;  %3180 = vmatprep.subr.bf16.mxu1 %v5072_v41 }
 0x5c0   :  { %3140 = vmatpush1.bf16.msra.mxu0 %v5074_v26  ;;  %3181 = vmatpush1.bf16.msra.mxu1 %v5076_v31 }
 0x5c1   :  { %3141 = vmatprep.subr.bf16.mxu0 %v5082_v27  ;;  %3182 = vmatprep.subr.bf16.mxu1 %v5084_v32 }
 0x5c4   :  { %3142 = vmatpush1.bf16.msra.mxu0 %v5086_v28  ;;  %3183 = vmatpush1.bf16.msra.mxu1 %v5088_v38 }
 0x5c5   :  { %3143 = vmatprep.subr.bf16.mxu0 %v5094_v35  ;;  %3184 = vmatprep.subr.bf16.mxu1 %v5096_v17 }
 0x5c8   :  { %3144 = vmatpush1.bf16.msra.mxu0 %v5098_v36  ;;  %3185 = vmatpush1.bf16.msra.mxu1 %v5100_v6 }
 0x5c9   :  { %3145 = vmatprep.subr.bf16.mxu0 %v5106_v20  ;;  %3186 = vmatprep.subr.bf16.mxu1 %v5108_v34 }
 0x5cc   :  { %3146 = vmatpush1.bf16.msra.mxu0 %v5110_v61  ;;  %3187 = vmatpush1.bf16.msra.mxu1 %v5112_v16 }
 0x5cd   :  { %3147 = vmatprep.subr.bf16.mxu0 %v5118_v15  ;;  %3188 = vmatprep.subr.bf16.mxu1 %v5120_v33 }
 0x5d0   :  { %3148 = vmatpush1.bf16.msra.mxu0 %v5122_v44  ;;  %3189 = vmatpush1.bf16.msra.mxu1 %v5124_v45 }
 0x5d1   :  { %3441 = vmatprep.subr.bf16.mxu0 %v5034_v37  ;;  %3482 = vmatprep.subr.bf16.mxu1 %v5036_v52 }
 0x686   :  { %v2859_v43 = vpop.f32.mrb[36].mxu0  ;;  %v2900_v56 = vpop.f32.mrb[36].mxu1 }
 0x687   :  { %v2907_v58 = vadd.f32 %v5326_v57, %v2859_v43  ;;  %v2909_v60 = vadd.f32 %v5327_v59, %v2900_v56  ;;  %v2861_v62 = vpop.f32.mrb[37].mxu0  ;;  %v2902_v63 = vpop.f32.mrb[37].mxu1 }
 0x688   :  { %v2908_v1 = vadd.f32 %v5328_v0, %v2861_v62  ;;  %v2910_v3 = vadd.f32 %v5329_v2, %v2902_v63  ;;  %v2863_v4 = vpop.f32.mrb[38].mxu0  ;;  %v2904_v5 = vpop.f32.mrb[38].mxu1  ;;  %v4423_v62 = vld [vmem:[#allocation11] sm:$0xff]   ;;  %v4641_v63 = vmov 0.0   ;;  %v4424_v0 = vld [vmem:[#allocation11 + $0x8] sm:$0xff]   ;;  %v4426_v2 = vld [vmem:[#allocation11 + $0x18] sm:$0xff]  }
 0x689   :  { %v2911_v7 = vmul.f32 0.5, %v2907_v58  ;;  %v2864_v8 = vpop.f32.mrb[39].mxu0  ;;  %v2905_v10 = vpop.f32.mrb[39].mxu1  ;;  %v4428_v4 = vld [vmem:[#allocation11 + $0x28] sm:$0xff]   ;;  %v4429_v5 = vld [vmem:[#allocation11 + $0x30] sm:$0xff]  }
 0x68a   :  { %v2915_v37 = vmul.f32 0.5, %v2908_v1  ;;  %v2920_v52 = vmul.f32 0.5, %v2910_v3  ;;  %v4425_v1 = vld [vmem:[#allocation11 + $0x10] sm:$0xff]   ;;  %v4427_v3 = vld [vmem:[#allocation11 + $0x20] sm:$0xff]  }
 0x68b   :  { %4481 = vtanh.f32 %v2911_v7  ;;  %v4430_v7 = vld [vmem:[#allocation11 + $0x38] sm:$0xff]  }
 0x68c   :  { %4483 = vtanh.f32 %v2915_v37  ;;  %v5334_v37 = vld [vmem:[#allocation36_spill] sm:$0xff] }
 0x68d   :  { %4485 = vtanh.f32 %v2909_v60 }
 0x68e   :  { %4487 = vtanh.f32 %v2920_v52 }
 0x695   :  { %v4482_v11 = vpop.eup %4481 }
 0x696   :  { %v4484_v12 = vpop.eup %4483  ;;  %v2913_v39 = vadd.f32 1.0, %v4482_v11  ;;  %v5335_v11 = vld [vmem:[#allocation37_spill] sm:$0xff] }
 0x697   :  { %v2917_v13 = vadd.f32 1.0, %v4484_v12  ;;  %v4486_v47 = vpop.eup %4485 }
 0x698   :  { %v2914_v46 = vmul.f32 0.5, %v2913_v39  ;;  %v4488_v53 = vpop.eup %4487 }
 0x699   :  { %v2918_v48 = vmul.f32 0.5, %v2917_v13  ;;  %v2922_v54 = vadd.f32 1.0, %v4488_v53 }
 0x69a   :  { %v2926_v50 = vmul.f32 %v4486_v47, %v2914_v46  ;;  %v5336_v46 = vld [vmem:[#allocation38_spill] sm:$0xff] }
 0x69b   :  { %v2925_v9 = vmul.f32 %v2918_v48, %v5179_v49  ;;  %v2923_v55 = vmul.f32 0.5, %v2922_v54  ;;  %v5337_v48 = vld [vmem:[#allocation39_spill] sm:$0xff] }
 0x69d   :  { %v5221_v51 = vadd.f32 %v2926_v50, %v2925_v9 }
 0x69f   :  { %4489 = vtanh.f32 %v5221_v51 }
 0x6a9   :  { %v4490_v43 = vpop.eup %4489 }
 0x6aa   :  { %v2929_v56 = vmul.f32 %v4490_v43, %v2923_v55 }
 0x6ac   :  { %v2940_v57 = vpack.c.bf16 %v2929_v56, %v2929_v56 }
 0x6ae   :  { %3166 = vmatmul.mubr.bf16.vlgmr.msra.gmra.mrb[40].mxu0 %v2940_v57  ;;  %3207 = vmatmul.mubr.bf16.vlgmr.msra.gmra.mrb[40].mxu1 %v2940_v57 }
 0x6af   :  { %3442 = vmatpush1.bf16.msra.mxu0 %v5038_v14  ;;  %3483 = vmatpush1.bf16.msra.mxu1 %v5040_v42  ;;  %v5330_v42 = vld [vmem:[#allocation32_spill] sm:$0xff] }
 0x6b0   :  { %3443 = vmatprep.subr.bf16.mxu0 %v5046_v18  ;;  %3484 = vmatprep.subr.bf16.mxu1 %v5048_v29  ;;  %v5331_v29 = vld [vmem:[#allocation33_spill] sm:$0xff] }
 0x6b1   :  { %3473 = vmatprep.mubr.bf16.mxu0 %v5315_v19  ;;  %3514 = vmatprep.mubr.bf16.mxu1 %v5315_v19 }
 0x6b3   :  { %3444 = vmatpush1.bf16.msra.mxu0 %v5050_v30  ;;  %3485 = vmatpush1.bf16.msra.mxu1 %v5052_v21 }
 0x6b4   :  { %3445 = vmatprep.subr.bf16.mxu0 %v5058_v22  ;;  %3486 = vmatprep.subr.bf16.mxu1 %v5060_v23  ;;  %v5332_v23 = vld [vmem:[#allocation34_spill] sm:$0xff] }
 0x6b7   :  { %3446 = vmatpush1.bf16.msra.mxu0 %v5062_v24  ;;  %3487 = vmatpush1.bf16.msra.mxu1 %v5064_v25  ;;  %v5333_v25 = vld [vmem:[#allocation35_spill] sm:$0xff] }
 0x6b8   :  { %3447 = vmatprep.subr.bf16.mxu0 %v5070_v40  ;;  %3488 = vmatprep.subr.bf16.mxu1 %v5072_v41 }
 0x6bb   :  { %3448 = vmatpush1.bf16.msra.mxu0 %v5074_v26  ;;  %3489 = vmatpush1.bf16.msra.mxu1 %v5076_v31 }
 0x6bc   :  { %3449 = vmatprep.subr.bf16.mxu0 %v5082_v27  ;;  %3490 = vmatprep.subr.bf16.mxu1 %v5084_v32 }
 0x6bf   :  { %3450 = vmatpush1.bf16.msra.mxu0 %v5086_v28  ;;  %3491 = vmatpush1.bf16.msra.mxu1 %v5088_v38 }
 0x6c0   :  { %3451 = vmatprep.subr.bf16.mxu0 %v5094_v35  ;;  %3492 = vmatprep.subr.bf16.mxu1 %v5096_v17 }
 0x6c3   :  { %3452 = vmatpush1.bf16.msra.mxu0 %v5098_v36  ;;  %3493 = vmatpush1.bf16.msra.mxu1 %v5100_v6 }
 0x6c4   :  { %3453 = vmatprep.subr.bf16.mxu0 %v5106_v20  ;;  %3494 = vmatprep.subr.bf16.mxu1 %v5108_v34 }
 0x6c7   :  { %3454 = vmatpush1.bf16.msra.mxu0 %v5110_v61  ;;  %3495 = vmatpush1.bf16.msra.mxu1 %v5112_v16 }
 0x6c8   :  { %3455 = vmatprep.subr.bf16.mxu0 %v5118_v15  ;;  %3496 = vmatprep.subr.bf16.mxu1 %v5120_v33 }
 0x6cb   :  { %3456 = vmatpush1.bf16.msra.mxu0 %v5122_v44  ;;  %3497 = vmatpush1.bf16.msra.mxu1 %v5124_v45 }
 0x6cc   :  { %4068 = vmatprep.subr.bf16.mxu0 %v4641_v63 }
 0x781   :  { %v3167_v19 = vpop.f32.mrb[40].mxu0  ;;  %v3208_v14 = vpop.f32.mrb[40].mxu1 }
 0x782   :  { %v3215_v18 = vadd.f32 %v5330_v42, %v3167_v19  ;;  %v3217_v30 = vadd.f32 %v5331_v29, %v3208_v14  ;;  %v3169_v21 = vpop.f32.mrb[41].mxu0  ;;  %v3210_v22 = vpop.f32.mrb[41].mxu1 }
 0x783   :  { %v3216_v24 = vadd.f32 %v5332_v23, %v3169_v21  ;;  %v3218_v40 = vadd.f32 %v5333_v25, %v3210_v22  ;;  %v3171_v41 = vpop.f32.mrb[42].mxu0  ;;  %v3212_v26 = vpop.f32.mrb[42].mxu1 }
 0x784   :  { %v3219_v31 = vmul.f32 0.5, %v3215_v18  ;;  %v3172_v27 = vpop.f32.mrb[43].mxu0  ;;  %v3213_v32 = vpop.f32.mrb[43].mxu1 }
 0x785   :  { %v3223_v28 = vmul.f32 0.5, %v3216_v24  ;;  %v3228_v38 = vmul.f32 0.5, %v3218_v40  ;;  %v4050_v27 = vld [vmem:[%s5289_s5] ss:$0 sm:$0xff] }
 0x786   :  { %4491 = vtanh.f32 %v3219_v31 }
 0x787   :  { %4493 = vtanh.f32 %v3223_v28 }
 0x788   :  { %4495 = vtanh.f32 %v3217_v30 }
 0x789   :  { %4497 = vtanh.f32 %v3228_v38 }
 0x790   :  { %v4492_v35 = vpop.eup %4491 }
 0x791   :  { %v4494_v17 = vpop.eup %4493  ;;  %v3221_v36 = vadd.f32 1.0, %v4492_v35 }
 0x792   :  { %v3225_v6 = vadd.f32 1.0, %v4494_v17  ;;  %v4496_v34 = vpop.eup %4495 }
 0x793   :  { %v3222_v20 = vmul.f32 0.5, %v3221_v36  ;;  %v4498_v44 = vpop.eup %4497 }
 0x794   :  { %v3226_v61 = vmul.f32 0.5, %v3225_v6  ;;  %v3230_v45 = vadd.f32 1.0, %v4498_v44 }
 0x795   :  { %v3234_v16 = vmul.f32 %v4496_v34, %v3222_v20 }
 0x796   :  { %v3233_v15 = vmul.f32 %v3226_v61, %v5221_v51  ;;  %v3231_v49 = vmul.f32 0.5, %v3230_v45 }
 0x798   :  { %v5261_v33 = vadd.f32 %v3234_v16, %v3233_v15 }
 0x79a   :  { %4499 = vtanh.f32 %v5261_v33 }
 0x7a4   :  { %v4500_v58 = vpop.eup %4499 }
 0x7a5   :  { %v3237_v59 = vmul.f32 %v4500_v58, %v3231_v49 }
 0x7a7   :  { %v3248_v60 = vpack.c.bf16 %v3237_v59, %v3237_v59 }
 0x7a9   :  { %3474 = vmatmul.mubr.bf16.vlgmr.msra.gmra.mrb[44].mxu0 %v3248_v60  ;;  %3515 = vmatmul.mubr.bf16.vlgmr.msra.gmra.mrb[44].mxu1 %v3248_v60 }
 0x7aa   :  { %4069 = vmatpush3.bf16.msra.mxu0 %v4423_v62  ;;  %4084 = vmatprep.mubr.msk.bf16.mxu0 %vm4642_vm0, %v4641_v63 }
 0x7ab   :  { %4070 = vmatprep.subr.bf16.mxu0 %v4641_v63 }
 0x7ae   :  { %4071 = vmatpush3.bf16.msra.mxu0 %v4424_v0 }
 0x7af   :  { %4072 = vmatprep.subr.bf16.mxu0 %v4641_v63 }
 0x7b2   :  { %4073 = vmatpush3.bf16.msra.mxu0 %v4425_v1 }
 0x7b3   :  { %4074 = vmatprep.subr.bf16.mxu0 %v4641_v63 }
 0x7b6   :  { %4075 = vmatpush3.bf16.msra.mxu0 %v4426_v2 }
 0x7b7   :  { %4076 = vmatprep.subr.bf16.mxu0 %v4641_v63 }
 0x7ba   :  { %4077 = vmatpush3.bf16.msra.mxu0 %v4427_v3 }
 0x7bb   :  { %4078 = vmatprep.subr.bf16.mxu0 %v4641_v63 }
 0x7be   :  { %4079 = vmatpush3.bf16.msra.mxu0 %v4428_v4 }
 0x7bf   :  { %4080 = vmatprep.subr.bf16.mxu0 %v4641_v63 }
 0x7c2   :  { %4081 = vmatpush3.bf16.msra.mxu0 %v4429_v5 }
 0x7c3   :  { %4082 = vmatprep.subr.bf16.mxu0 %v4641_v63 }
 0x7c6   :  { %4083 = vmatpush3.bf16.msra.mxu0 %v4430_v7 }
 0x87c   :  { %v3475_v8 = vpop.f32.mrb[44].mxu0  ;;  %v3516_v10 = vpop.f32.mrb[44].mxu1 }
 0x87d   :  { %v3523_v52 = vadd.f32 %v5334_v37, %v3475_v8  ;;  %v3525_v12 = vadd.f32 %v5335_v11, %v3516_v10  ;;  %v3477_v39 = vpop.f32.mrb[45].mxu0  ;;  %v3518_v13 = vpop.f32.mrb[45].mxu1 }
 0x87e   :  { %v3524_v47 = vadd.f32 %v5336_v46, %v3477_v39  ;;  %v3526_v50 = vadd.f32 %v5337_v48, %v3518_v13  ;;  %v3479_v9 = vpop.f32.mrb[46].mxu0  ;;  %v3520_v51 = vpop.f32.mrb[46].mxu1 }
 0x87f   :  { %v3527_v53 = vmul.f32 0.5, %v3523_v52  ;;  %v3480_v54 = vpop.f32.mrb[47].mxu0  ;;  %v3521_v55 = vpop.f32.mrb[47].mxu1 }
 0x880   :  { %v3531_v43 = vmul.f32 0.5, %v3524_v47  ;;  %v3536_v56 = vmul.f32 0.5, %v3526_v50 }
 0x881   :  { %4501 = vtanh.f32 %v3527_v53 }
 0x882   :  { %4503 = vtanh.f32 %v3531_v43 }
 0x883   :  { %4505 = vtanh.f32 %v3525_v12 }
 0x884   :  { %4507 = vtanh.f32 %v3536_v56 }
 0x88b   :  { %v4502_v57 = vpop.eup %4501 }
 0x88c   :  { %v4504_v19 = vpop.eup %4503  ;;  %v3529_v14 = vadd.f32 1.0, %v4502_v57 }
 0x88d   :  { %v3533_v42 = vadd.f32 1.0, %v4504_v19  ;;  %v4506_v29 = vpop.eup %4505 }
 0x88e   :  { %v3530_v18 = vmul.f32 0.5, %v3529_v14  ;;  %v4508_v24 = vpop.eup %4507 }
 0x88f   :  { %v3534_v30 = vmul.f32 0.5, %v3533_v42  ;;  %v3538_v25 = vadd.f32 1.0, %v4508_v24 }
 0x890   :  { %v3542_v21 = vmul.f32 %v4506_v29, %v3530_v18 }
 0x891   :  { %v3541_v22 = vmul.f32 %v3534_v30, %v5261_v33  ;;  %v3539_v40 = vmul.f32 0.5, %v3538_v25 }
 0x893   :  { %v3543_v23 = vadd.f32 %v3542_v21, %v3541_v22 }
 0x895   :  { %4509 = vtanh.f32 %v3543_v23 }
 0x89f   :  { %v4510_v41 = vpop.eup %4509 }
 0x8a0   :  { %v3545_v26 = vmul.f32 %v4510_v41, %v3539_v40 }
 0x8a2   :  { %v3549_v31 = vpack.c.bf16 %v3545_v26, %v3545_v26 }
 0x8a4   :  { %4085 = vmatmul.mubr.bf16.vlgmr.msra.gmra.mrb[48].mxu0 %v3549_v31 }
 0x977   :  { %v3655_v32 = vpop.f32.mrb[48].mxu0 }
 0x978   :  { %v3656_v28 = vadd.f32 %v4050_v27, %v3655_v32  ;;  %v4086_v38 = vpop.f32.mrb[49].mxu0 }
 0x979   :  { %v3658_v35 = vpop.f32.mrb[50].mxu0 }
 0x97a   :  { %3661 = vst [vmem:[#allocation13] sm:$0xff] %v3656_v28  ;;  %v4087_v17 = vpop.f32.mrb[51].mxu0 }
 0x97b   :  { %4610 = shalt.err (!%p4607_p8)
}
 0x97c   :  { %s4611_s5 = scalar_lea.hbm %s5290_s6, 128 }
 0x97d   :  { %p4612_p9 = scmp.ne.s32.totalorder %s5290_s6, %s4611_s5  ;;  %p4615_p10 = scmp.lt.u32.totalorder %s4611_s5, %s5290_s6 }
 0x97f   :  { %p4617_p11 = pnand %p4615_p10, %p4612_p9 }
 0x981   :  { %4620 = shalt.err (!%p4617_p11)
}
 0x982   :  { %3671 = dma.vmem_to_hbm [thread:$0]  %s3669_s26, 128, %s5290_s6, [#allocation7]  }
 0x983   :  { %4627 = dma.done.wait [#allocation7], 128  }
 0x984   :  { %4628 = vsyncadd [#allocation7], 4294967168 }
 0x985   :  { %3675 = vsyncpa [#allocation6], 1 }
 0x986   :  { %3676 = vsyncpa [#allocation9], 1 }
 0x987   :  { %3677 = vsyncpa [#allocation12], 1 }
 0x988   :  { %3678 = vsyncpa [#allocation7], 1 }

</bundles_post_ra>
